<compile_context>
chip_gen: v5e
topology: v5e:2x2
jax: 0.10.0
libtpu: 0.0.40
codegen_flags: <defaults>
</compile_context>

<pallas_src>
from functools import partial

import jax
import jax.numpy as jnp
from jax import lax
from jax.experimental import pallas as pl
from jax.experimental.pallas import tpu as pltpu


# ------------------------------ tiling constants ------------------------------
LANE = 128                    # all feature widths padded to a multiple of this
ROW_TILE = 256                # node-row tile (multiple of 8; 128-multiple for v5e)
K_TILE = 256                  # adjacency-column (reduction) tile
EDGE_TILE = 128               # edges per grid step in the scoring kernel
MATMUL_DTYPE = jnp.bfloat16   # matmul operand dtype (accumulation stays f32)
VMEM_LIMIT = 64 * 1024 * 1024


def _round_up(x, m):
    return (x + m - 1) // m * m


# ------------------------------ Pallas kernels --------------------------------
def linear_kernel(x_ref, wt_ref, o_ref):
    """Per-layer linear (hoisted): (TM, Fin_p) @ (Fin_p, Fout_p) -> bf16 tile."""
    o_ref[...] = jnp.dot(x_ref[...], wt_ref[...],
                         preferred_element_type=jnp.float32).astype(o_ref.dtype)


def aggregate_kernel(a_ref, xw_ref, b_ref, o_ref, acc_ref, *, apply_relu):
    """act(A_norm @ XW + b), accumulated over the K grid axis (P3 pattern)."""
    k = pl.program_id(1)

    @pl.when(k == 0)
    def _():
        acc_ref[...] = jnp.zeros_like(acc_ref)

    acc_ref[...] += jnp.dot(a_ref[...], xw_ref[...],
                            preferred_element_type=jnp.float32)

    @pl.when(k == pl.num_programs(1) - 1)
    def _():
        y = acc_ref[...] + b_ref[...]
        if apply_relu:
            y = jnp.maximum(y, 0.0)
        o_ref[...] = y.astype(o_ref.dtype)


def edge_score_kernel(src_ref, dst_ref, ht_ref, o_ref):
    """u_dot_v for a block of EDGE_TILE edges (edges on the lane axis).

    Endpoint features are gathered in-kernel via a one-hot MXU matmul against
    the VMEM-resident h^T; the output block is a lane-dense (1, EDGE_TILE) row.
    """
    c_pad, n_pad = ht_ref.shape
    te = src_ref.shape[1]
    node_ids = lax.broadcasted_iota(jnp.int32, (n_pad, te), 0)
    onehot_u = (node_ids == src_ref[...]).astype(jnp.float32)     # (N_pad, TE)
    onehot_v = (node_ids == dst_ref[...]).astype(jnp.float32)
    hu_t = jnp.dot(ht_ref[...], onehot_u, preferred_element_type=jnp.float32)
    hv_t = jnp.dot(ht_ref[...], onehot_v, preferred_element_type=jnp.float32)
    o_ref[...] = jnp.sum(hu_t * hv_t, axis=0, keepdims=True)      # (1, TE)


# ------------------------------ wrappers ---------------------------------------
def linear_xwt(x, wt_pad):
    """x: (N_pad, Fin_p) float; wt_pad: (Fin_p, Fout_p). Returns bf16 (N_pad, Fout_p)."""
    n_pad, fin_p = x.shape
    fout_p = wt_pad.shape[1]
    return pl.pallas_call(
        linear_kernel,
        out_shape=jax.ShapeDtypeStruct((n_pad, fout_p), MATMUL_DTYPE),
        grid=(n_pad // ROW_TILE,),
        in_specs=[pl.BlockSpec((ROW_TILE, fin_p), lambda i: (i, 0)),
                  pl.BlockSpec((fin_p, fout_p), lambda i: (0, 0))],   # resident
        out_specs=pl.BlockSpec((ROW_TILE, fout_p), lambda i: (i, 0)),
        compiler_params=pltpu.CompilerParams(
            dimension_semantics=("parallel",),
            vmem_limit_bytes=VMEM_LIMIT),
    )(x.astype(MATMUL_DTYPE), wt_pad.astype(MATMUL_DTYPE))


def aggregate(a_norm, xw, bias_pad, apply_relu):
    """a_norm: (N_pad, N_pad) bf16; xw: (N_pad, Fout_p) bf16; bias_pad: (1, Fout_p) f32."""
    n_pad = a_norm.shape[0]
    fout_p = xw.shape[1]
    grid = (n_pad // ROW_TILE, n_pad // K_TILE)   # reduction axis last
    return pl.pallas_call(
        partial(aggregate_kernel, apply_relu=apply_relu),
        out_shape=jax.ShapeDtypeStruct((n_pad, fout_p), jnp.float32),
        grid=grid,
        in_specs=[pl.BlockSpec((ROW_TILE, K_TILE), lambda i, k: (i, k)),
                  pl.BlockSpec((K_TILE, fout_p), lambda i, k: (k, 0)),
                  pl.BlockSpec((1, fout_p), lambda i, k: (0, 0))],    # bias resident
        out_specs=pl.BlockSpec((ROW_TILE, fout_p), lambda i, k: (i, 0)),
        scratch_shapes=[pltpu.VMEM((ROW_TILE, fout_p), jnp.float32)],
        compiler_params=pltpu.CompilerParams(
            dimension_semantics=("parallel", "arbitrary"),
            vmem_limit_bytes=VMEM_LIMIT),
    )(a_norm, xw, bias_pad)


def edge_scores_fused(h, src_all, dst_all):
    """h: (N_pad, C_pad) f32; src_all/dst_all: (1, E_pad) int32 -> (1, E_pad) f32."""
    ht = jnp.transpose(h)                          # (C_pad, N_pad)
    c_pad, n_pad = ht.shape
    e_pad = src_all.shape[1]
    return pl.pallas_call(
        edge_score_kernel,
        out_shape=jax.ShapeDtypeStruct((1, e_pad), jnp.float32),
        grid=(e_pad // EDGE_TILE,),
        in_specs=[pl.BlockSpec((1, EDGE_TILE), lambda i: (0, i)),
                  pl.BlockSpec((1, EDGE_TILE), lambda i: (0, i)),
                  pl.BlockSpec((c_pad, n_pad), lambda i: (0, 0))],    # h^T resident
        out_specs=pl.BlockSpec((1, EDGE_TILE), lambda i: (0, i)),
        compiler_params=pltpu.CompilerParams(
            dimension_semantics=("parallel",),
            vmem_limit_bytes=VMEM_LIMIT),
    )(src_all, dst_all, ht)


def build_norm_adjacency(src, dst, n_pad):
    """Dense normalized adjacency D_in^-1/2 A D_out^-1/2, A[dst, src] = edge count.

    # TODO(synk): sparse aggregation (CSR row offsets + gather/segment-sum kernel)
    # for graphs where the dense O(N^2) adjacency is infeasible.
    """
    a = jnp.zeros((n_pad, n_pad), jnp.float32).at[dst, src].add(1.0)
    out_deg = jnp.maximum(a.sum(axis=0), 1.0)      # out-degree of src nodes
    in_deg = jnp.maximum(a.sum(axis=1), 1.0)       # in-degree of dst nodes
    return (in_deg ** -0.5)[:, None] * a * (out_deg ** -0.5)[None, :]


def gcn_forward(features, pos_src, pos_dst, neg_src, neg_dst, params):
    """Stacked GraphConv layers + fused u_dot_v scoring on pos & neg graphs."""
    n, in_feats = features.shape
    n_pad = _round_up(n, max(ROW_TILE, K_TILE))

    a_norm = build_norm_adjacency(pos_src, pos_dst, n_pad).astype(MATMUL_DTYPE)

    fin_p = _round_up(in_feats, LANE)
    h = jnp.zeros((n_pad, fin_p), jnp.float32).at[:n, :in_feats].set(features)

    n_layers_total = len(params)
    for i, (w, b) in enumerate(params):
        # dropout between layers is identity in inference mode
        # TODO(synk): training-mode dropout (stateful PRNG mask) not implemented.
        fout, fin = w.shape
        fin_p = _round_up(fin, LANE)
        fout_p = _round_up(fout, LANE)
        wt_pad = jnp.zeros((fin_p, fout_p), jnp.float32).at[:fin, :fout].set(w.T)
        b_pad = jnp.zeros((1, fout_p), jnp.float32).at[0, :fout].set(b)

        xw = linear_xwt(h, wt_pad)                    # hoisted linear, bf16 out
        apply_relu = i < n_layers_total - 1           # last GraphConv: no activation
        h = aggregate(a_norm, xw, b_pad, apply_relu)  # (n_pad, fout_p) f32

    # pos + neg u_dot_v scoring fused into a single lane-dense pallas_call
    e_pos = pos_src.shape[0]
    e_neg = neg_src.shape[0]
    e_tot = e_pos + e_neg
    e_pad = _round_up(e_tot, EDGE_TILE)
    src_all = jnp.zeros((1, e_pad), jnp.int32).at[0, :e_tot].set(
        jnp.concatenate([pos_src, neg_src]).astype(jnp.int32))
    dst_all = jnp.zeros((1, e_pad), jnp.int32).at[0, :e_tot].set(
        jnp.concatenate([pos_dst, neg_dst]).astype(jnp.int32))

    scores = edge_scores_fused(h, src_all, dst_all)   # (1, e_pad)

    # quant=True path scores h.unsqueeze(1): shape (E, 1, 1)
    pos_score = scores[0, :e_pos].reshape(e_pos, 1, 1)
    neg_score = scores[0, e_pos:e_tot].reshape(e_neg, 1, 1)
    return pos_score, neg_score


# ------------------------------ reference & setup ------------------------------
def gcn_reference(features, pos_src, pos_dst, neg_src, neg_dst, params):
    """Plain-JAX reference mirroring the kernel's bf16-operand / f32-accum math."""
    n = features.shape[0]
    a = jnp.zeros((n, n), jnp.float32).at[pos_dst, pos_src].add(1.0)
    out_deg = jnp.maximum(a.sum(axis=0), 1.0)
    in_deg = jnp.maximum(a.sum(axis=1), 1.0)
    a = (in_deg ** -0.5)[:, None] * a * (out_deg ** -0.5)[None, :]
    a_lp = a.astype(MATMUL_DTYPE).astype(jnp.float32)

    h = features
    for i, (w, b) in enumerate(params):
        x_lp = h.astype(MATMUL_DTYPE).astype(jnp.float32)
        wt_lp = w.T.astype(MATMUL_DTYPE).astype(jnp.float32)
        xw = (x_lp @ wt_lp).astype(MATMUL_DTYPE).astype(jnp.float32)
        h = a_lp @ xw + b
        if i < len(params) - 1:
            h = jnp.maximum(h, 0.0)
    pos = jnp.sum(h[pos_src] * h[pos_dst], axis=-1)[:, None, None]
    neg = jnp.sum(h[neg_src] * h[neg_dst], axis=-1)[:, None, None]
    return pos, neg


def init_params(key, in_feats, n_hidden, n_classes, n_layers):
    """GraphConv weights: (out_feats, in_feats) + bias (out_feats,)."""
    dims = [(in_feats, n_hidden)] + [(n_hidden, n_hidden)] * (n_layers - 1) + \
           [(n_hidden, n_classes)]
    params = []
    for (fin, fout) in dims:
        key, kw = jax.random.split(key)
        scale = (6.0 / (fin + fout)) ** 0.5
        w = jax.random.uniform(kw, (fout, fin), jnp.float32, -scale, scale)
        b = jnp.zeros((fout,), jnp.float32)
        params.append((w, b))
    return params


if __name__ == "__main__":
    key = jax.random.PRNGKey(0)

    N = 16            # nodes
    IN_FEATS = 8
    N_HIDDEN = 32
    N_CLASSES = 16
    N_LAYERS = 2      # -> 3 GraphConv layers total (in->hid, hid->hid, hid->cls)
    E_POS_RAND = 32
    E_NEG = 32

    k_feat, k_ps, k_pd, k_ns, k_nd, k_param = jax.random.split(key, 6)

    features = jax.random.normal(k_feat, (N, IN_FEATS), jnp.float32)

    # positive graph: random edges + self-loops (avoids 0-in-degree check)
    pos_src = jnp.concatenate(
        [jax.random.randint(k_ps, (E_POS_RAND,), 0, N), jnp.arange(N)]).astype(jnp.int32)
    pos_dst = jnp.concatenate(
        [jax.random.randint(k_pd, (E_POS_RAND,), 0, N), jnp.arange(N)]).astype(jnp.int32)

    # negative graph: random edges (only used for scoring)
    neg_src = jax.random.randint(k_ns, (E_NEG,), 0, N).astype(jnp.int32)
    neg_dst = jax.random.randint(k_nd, (E_NEG,), 0, N).astype(jnp.int32)

    params = init_params(k_param, IN_FEATS, N_HIDDEN, N_CLASSES, N_LAYERS)

    pos_score, neg_score = jax.jit(gcn_forward)(
        features, pos_src, pos_dst, neg_src, neg_dst, params)
    jax.block_until_ready((pos_score, neg_score))

    assert pos_score.shape == (E_POS_RAND + N, 1, 1)
    assert neg_score.shape == (E_NEG, 1, 1)

    # correctness check against a plain-JAX reference (loose tol for bf16 operands)
    pos_ref, neg_ref = gcn_reference(
        features, pos_src, pos_dst, neg_src, neg_dst, params)
    assert bool(jnp.allclose(pos_score, pos_ref, rtol=5e-2, atol=0.5)), "pos mismatch"
    assert bool(jnp.allclose(neg_score, neg_ref, rtol=5e-2, atol=0.5)), "neg mismatch"

    print("KERNEL_OK")
</pallas_src>

<mosaic_0001>
module attributes {stable_mosaic.version = 11 : i64} {
  func.func @linear_kernel(%arg0: i32, %arg1: memref<256x128xbf16, #tpu.memory_space<vmem>>, %arg2: memref<128x128xbf16, #tpu.memory_space<vmem>>, %arg3: memref<256x128xbf16, #tpu.memory_space<vmem>>) attributes {dimension_semantics = [#tpu.dimension_semantics<parallel>], iteration_bounds = array<i64: 1>, scalar_prefetch = 0 : i64, scratch_operands = 0 : i64, tpu.core_type = #tpu.core_type<tc>, window_params = [{transform_indices = @transform_0, window_bounds = array<i64: 256, 128>}, {pipeline_mode = #tpu.pipeline_mode<synchronous>, transform_indices = @transform_1, window_bounds = array<i64: 128, 128>}, {transform_indices = @transform_2, window_bounds = array<i64: 256, 128>}]} {
    %c0 = arith.constant 0 : index
    %c0_0 = arith.constant 0 : index
    %0 = vector.load %arg1[%c0, %c0_0] : memref<256x128xbf16, #tpu.memory_space<vmem>>, vector<256x128xbf16>
    %c0_1 = arith.constant 0 : index
    %c0_2 = arith.constant 0 : index
    %1 = vector.load %arg2[%c0_1, %c0_2] : memref<128x128xbf16, #tpu.memory_space<vmem>>, vector<128x128xbf16>
    %cst = arith.constant dense<0.000000e+00> : vector<256x128xf32>
    %2 = tpu.matmul %0, %1, %cst {dimension_numbers = #tpu.dot_dimension_numbers<[1], [0], [0], [1], [0, 0, 1, 1], [], []>} : vector<256x128xbf16>, vector<128x128xbf16>, vector<256x128xf32> -> vector<256x128xf32>
    %3 = arith.truncf %2 : vector<256x128xf32> to vector<256x128xbf16>
    %c0_3 = arith.constant 0 : index
    %c0_4 = arith.constant 0 : index
    %4 = vector.load %arg3[%c0_3, %c0_4] : memref<256x128xbf16, #tpu.memory_space<vmem>>, vector<256x128xbf16>
    tpu.vector_store %arg3[%c0_3, %c0_4], %3 {strides = array<i32>} : memref<256x128xbf16, #tpu.memory_space<vmem>>, vector<256x128xbf16>,
    return
  }
  func.func @transform_0(%arg0: i32) -> (i32, i32) {
    %c0_i32 = arith.constant 0 : i32
    %c0_i32_0 = arith.constant 0 : i32
    return %arg0, %c0_i32 : i32, i32
  }
  func.func @transform_1(%arg0: i32) -> (i32, i32) {
    %c0_i32 = arith.constant 0 : i32
    %c0_i32_0 = arith.constant 0 : i32
    %c0_i32_1 = arith.constant 0 : i32
    return %c0_i32, %c0_i32_0 : i32, i32
  }
  func.func @transform_2(%arg0: i32) -> (i32, i32) {
    %c0_i32 = arith.constant 0 : i32
    %c0_i32_0 = arith.constant 0 : i32
    return %arg0, %c0_i32 : i32, i32
  }
}

module attributes {stable_mosaic.version = 11 : i64} {
  func.func @aggregate_kernel(%arg0: i32, %arg1: i32, %arg2: memref<256x256xbf16, #tpu.memory_space<vmem>>, %arg3: memref<256x128xbf16, #tpu.memory_space<vmem>>, %arg4: memref<1x128xf32, #tpu.memory_space<vmem>>, %arg5: memref<256x128xf32, #tpu.memory_space<vmem>>, %arg6: memref<256x128xf32, #tpu.memory_space<vmem>>) attributes {dimension_semantics = [#tpu.dimension_semantics<parallel>, #tpu.dimension_semantics<arbitrary>], iteration_bounds = array<i64: 1, 1>, scalar_prefetch = 0 : i64, scratch_operands = 1 : i64, tpu.core_type = #tpu.core_type<tc>, window_params = [{transform_indices = @transform_0, window_bounds = array<i64: 256, 256>}, {transform_indices = @transform_1, window_bounds = array<i64: 256, 128>}, {pipeline_mode = #tpu.pipeline_mode<synchronous>, transform_indices = @transform_2, window_bounds = array<i64: 1, 128>}, {transform_indices = @transform_3, window_bounds = array<i64: 256, 128>}]} {
    %c0_i32 = arith.constant 0 : i32
    %0 = arith.cmpi eq, %arg1, %c0_i32 : i32
    %1 = arith.extui %0 : i1 to i32
    %c0_i32_0 = arith.constant 0 : i32
    %2 = arith.cmpi ne, %1, %c0_i32_0 : i32
    scf.if %2 {
      %cst_10 = arith.constant 0.000000e+00 : f32
      %12 = vector.broadcast %cst_10 : f32 to vector<256x128xf32>
      %c0_11 = arith.constant 0 : index
      %c0_12 = arith.constant 0 : index
      %13 = vector.load %arg6[%c0_11, %c0_12] : memref<256x128xf32, #tpu.memory_space<vmem>>, vector<256x128xf32>
      tpu.vector_store %arg6[%c0_11, %c0_12], %12 {strides = array<i32>} : memref<256x128xf32, #tpu.memory_space<vmem>>, vector<256x128xf32>,
    } else {
    }
    %c0 = arith.constant 0 : index
    %c0_1 = arith.constant 0 : index
    %3 = vector.load %arg6[%c0, %c0_1] : memref<256x128xf32, #tpu.memory_space<vmem>>, vector<256x128xf32>
    %c0_2 = arith.constant 0 : index
    %c0_3 = arith.constant 0 : index
    %4 = vector.load %arg2[%c0_2, %c0_3] : memref<256x256xbf16, #tpu.memory_space<vmem>>, vector<256x256xbf16>
    %c0_4 = arith.constant 0 : index
    %c0_5 = arith.constant 0 : index
    %5 = vector.load %arg3[%c0_4, %c0_5] : memref<256x128xbf16, #tpu.memory_space<vmem>>, vector<256x128xbf16>
    %cst = arith.constant dense<0.000000e+00> : vector<256x128xf32>
    %6 = tpu.matmul %4, %5, %cst {dimension_numbers = #tpu.dot_dimension_numbers<[1], [0], [0], [1], [0, 0, 1, 1], [], []>} : vector<256x256xbf16>, vector<256x128xbf16>, vector<256x128xf32> -> vector<256x128xf32>
    %7 = arith.addf %3, %6 : vector<256x128xf32>
    %c0_6 = arith.constant 0 : index
    %c0_7 = arith.constant 0 : index
    %8 = vector.load %arg6[%c0_6, %c0_7] : memref<256x128xf32, #tpu.memory_space<vmem>>, vector<256x128xf32>
    tpu.vector_store %arg6[%c0_6, %c0_7], %7 {strides = array<i32>} : memref<256x128xf32, #tpu.memory_space<vmem>>, vector<256x128xf32>,
    %c0_i32_8 = arith.constant 0 : i32
    %9 = arith.cmpi eq, %arg1, %c0_i32_8 : i32
    %10 = arith.extui %9 : i1 to i32
    %c0_i32_9 = arith.constant 0 : i32
    %11 = arith.cmpi ne, %10, %c0_i32_9 : i32
    scf.if %11 {
      %c0_10 = arith.constant 0 : index
      %c0_11 = arith.constant 0 : index
      %12 = vector.load %arg6[%c0_10, %c0_11] : memref<256x128xf32, #tpu.memory_space<vmem>>, vector<256x128xf32>
      %c0_12 = arith.constant 0 : index
      %c0_13 = arith.constant 0 : index
      %13 = vector.load %arg4[%c0_12, %c0_13] : memref<1x128xf32, #tpu.memory_space<vmem>>, vector<1x128xf32>
      %14 = vector.broadcast %13 : vector<1x128xf32> to vector<256x128xf32>
      %15 = arith.addf %12, %14 : vector<256x128xf32>
      %cst_14 = arith.constant 0.000000e+00 : f32
      %16 = vector.broadcast %cst_14 : f32 to vector<256x128xf32>
      %17 = arith.maximumf %15, %16 : vector<256x128xf32>
      %c0_15 = arith.constant 0 : index
      %c0_16 = arith.constant 0 : index
      %18 = vector.load %arg5[%c0_15, %c0_16] : memref<256x128xf32, #tpu.memory_space<vmem>>, vector<256x128xf32>
      tpu.vector_store %arg5[%c0_15, %c0_16], %17 {strides = array<i32>} : memref<256x128xf32, #tpu.memory_space<vmem>>, vector<256x128xf32>,
    } else {
    }
    return
  }
  func.func @transform_0(%arg0: i32, %arg1: i32) -> (i32, i32) {
    %c0_i32 = arith.constant 0 : i32
    return %arg0, %arg1 : i32, i32
  }
  func.func @transform_1(%arg0: i32, %arg1: i32) -> (i32, i32) {
    %c0_i32 = arith.constant 0 : i32
    %c0_i32_0 = arith.constant 0 : i32
    return %arg1, %c0_i32 : i32, i32
  }
  func.func @transform_2(%arg0: i32, %arg1: i32) -> (i32, i32) {
    %c0_i32 = arith.constant 0 : i32
    %c0_i32_0 = arith.constant 0 : i32
    %c0_i32_1 = arith.constant 0 : i32
    return %c0_i32, %c0_i32_0 : i32, i32
  }
  func.func @transform_3(%arg0: i32, %arg1: i32) -> (i32, i32) {
    %c0_i32 = arith.constant 0 : i32
    %c0_i32_0 = arith.constant 0 : i32
    return %arg0, %c0_i32 : i32, i32
  }
}

module attributes {stable_mosaic.version = 11 : i64} {
  func.func @aggregate_kernel(%arg0: i32, %arg1: i32, %arg2: memref<256x256xbf16, #tpu.memory_space<vmem>>, %arg3: memref<256x128xbf16, #tpu.memory_space<vmem>>, %arg4: memref<1x128xf32, #tpu.memory_space<vmem>>, %arg5: memref<256x128xf32, #tpu.memory_space<vmem>>, %arg6: memref<256x128xf32, #tpu.memory_space<vmem>>) attributes {dimension_semantics = [#tpu.dimension_semantics<parallel>, #tpu.dimension_semantics<arbitrary>], iteration_bounds = array<i64: 1, 1>, scalar_prefetch = 0 : i64, scratch_operands = 1 : i64, tpu.core_type = #tpu.core_type<tc>, window_params = [{transform_indices = @transform_0, window_bounds = array<i64: 256, 256>}, {transform_indices = @transform_1, window_bounds = array<i64: 256, 128>}, {pipeline_mode = #tpu.pipeline_mode<synchronous>, transform_indices = @transform_2, window_bounds = array<i64: 1, 128>}, {transform_indices = @transform_3, window_bounds = array<i64: 256, 128>}]} {
    %c0_i32 = arith.constant 0 : i32
    %0 = arith.cmpi eq, %arg1, %c0_i32 : i32
    %1 = arith.extui %0 : i1 to i32
    %c0_i32_0 = arith.constant 0 : i32
    %2 = arith.cmpi ne, %1, %c0_i32_0 : i32
    scf.if %2 {
      %cst_10 = arith.constant 0.000000e+00 : f32
      %12 = vector.broadcast %cst_10 : f32 to vector<256x128xf32>
      %c0_11 = arith.constant 0 : index
      %c0_12 = arith.constant 0 : index
      %13 = vector.load %arg6[%c0_11, %c0_12] : memref<256x128xf32, #tpu.memory_space<vmem>>, vector<256x128xf32>
      tpu.vector_store %arg6[%c0_11, %c0_12], %12 {strides = array<i32>} : memref<256x128xf32, #tpu.memory_space<vmem>>, vector<256x128xf32>,
    } else {
    }
    %c0 = arith.constant 0 : index
    %c0_1 = arith.constant 0 : index
    %3 = vector.load %arg6[%c0, %c0_1] : memref<256x128xf32, #tpu.memory_space<vmem>>, vector<256x128xf32>
    %c0_2 = arith.constant 0 : index
    %c0_3 = arith.constant 0 : index
    %4 = vector.load %arg2[%c0_2, %c0_3] : memref<256x256xbf16, #tpu.memory_space<vmem>>, vector<256x256xbf16>
    %c0_4 = arith.constant 0 : index
    %c0_5 = arith.constant 0 : index
    %5 = vector.load %arg3[%c0_4, %c0_5] : memref<256x128xbf16, #tpu.memory_space<vmem>>, vector<256x128xbf16>
    %cst = arith.constant dense<0.000000e+00> : vector<256x128xf32>
    %6 = tpu.matmul %4, %5, %cst {dimension_numbers = #tpu.dot_dimension_numbers<[1], [0], [0], [1], [0, 0, 1, 1], [], []>} : vector<256x256xbf16>, vector<256x128xbf16>, vector<256x128xf32> -> vector<256x128xf32>
    %7 = arith.addf %3, %6 : vector<256x128xf32>
    %c0_6 = arith.constant 0 : index
    %c0_7 = arith.constant 0 : index
    %8 = vector.load %arg6[%c0_6, %c0_7] : memref<256x128xf32, #tpu.memory_space<vmem>>, vector<256x128xf32>
    tpu.vector_store %arg6[%c0_6, %c0_7], %7 {strides = array<i32>} : memref<256x128xf32, #tpu.memory_space<vmem>>, vector<256x128xf32>,
    %c0_i32_8 = arith.constant 0 : i32
    %9 = arith.cmpi eq, %arg1, %c0_i32_8 : i32
    %10 = arith.extui %9 : i1 to i32
    %c0_i32_9 = arith.constant 0 : i32
    %11 = arith.cmpi ne, %10, %c0_i32_9 : i32
    scf.if %11 {
      %c0_10 = arith.constant 0 : index
      %c0_11 = arith.constant 0 : index
      %12 = vector.load %arg6[%c0_10, %c0_11] : memref<256x128xf32, #tpu.memory_space<vmem>>, vector<256x128xf32>
      %c0_12 = arith.constant 0 : index
      %c0_13 = arith.constant 0 : index
      %13 = vector.load %arg4[%c0_12, %c0_13] : memref<1x128xf32, #tpu.memory_space<vmem>>, vector<1x128xf32>
      %14 = vector.broadcast %13 : vector<1x128xf32> to vector<256x128xf32>
      %15 = arith.addf %12, %14 : vector<256x128xf32>
      %c0_14 = arith.constant 0 : index
      %c0_15 = arith.constant 0 : index
      %16 = vector.load %arg5[%c0_14, %c0_15] : memref<256x128xf32, #tpu.memory_space<vmem>>, vector<256x128xf32>
      tpu.vector_store %arg5[%c0_14, %c0_15], %15 {strides = array<i32>} : memref<256x128xf32, #tpu.memory_space<vmem>>, vector<256x128xf32>,
    } else {
    }
    return
  }
  func.func @transform_0(%arg0: i32, %arg1: i32) -> (i32, i32) {
    %c0_i32 = arith.constant 0 : i32
    return %arg0, %arg1 : i32, i32
  }
  func.func @transform_1(%arg0: i32, %arg1: i32) -> (i32, i32) {
    %c0_i32 = arith.constant 0 : i32
    %c0_i32_0 = arith.constant 0 : i32
    return %arg1, %c0_i32 : i32, i32
  }
  func.func @transform_2(%arg0: i32, %arg1: i32) -> (i32, i32) {
    %c0_i32 = arith.constant 0 : i32
    %c0_i32_0 = arith.constant 0 : i32
    %c0_i32_1 = arith.constant 0 : i32
    return %c0_i32, %c0_i32_0 : i32, i32
  }
  func.func @transform_3(%arg0: i32, %arg1: i32) -> (i32, i32) {
    %c0_i32 = arith.constant 0 : i32
    %c0_i32_0 = arith.constant 0 : i32
    return %arg0, %c0_i32 : i32, i32
  }
}

module attributes {stable_mosaic.version = 11 : i64} {
  func.func @edge_score_kernel(%arg0: i32, %arg1: memref<1x128xi32, #tpu.memory_space<vmem>>, %arg2: memref<1x128xi32, #tpu.memory_space<vmem>>, %arg3: memref<128x256xf32, #tpu.memory_space<vmem>>, %arg4: memref<1x128xf32, #tpu.memory_space<vmem>>) attributes {dimension_semantics = [#tpu.dimension_semantics<parallel>], iteration_bounds = array<i64: 1>, scalar_prefetch = 0 : i64, scratch_operands = 0 : i64, tpu.core_type = #tpu.core_type<tc>, window_params = [{transform_indices = @transform_0, window_bounds = array<i64: 1, 128>}, {transform_indices = @transform_1, window_bounds = array<i64: 1, 128>}, {pipeline_mode = #tpu.pipeline_mode<synchronous>, transform_indices = @transform_2, window_bounds = array<i64: 128, 256>}, {transform_indices = @transform_3, window_bounds = array<i64: 1, 128>}]} {
    %0 = tpu.iota {dimensions = array<i32: 0>} : vector<256x128xi32>
    %c0 = arith.constant 0 : index
    %c0_0 = arith.constant 0 : index
    %1 = vector.load %arg1[%c0, %c0_0] : memref<1x128xi32, #tpu.memory_space<vmem>>, vector<1x128xi32>
    %2 = vector.broadcast %1 : vector<1x128xi32> to vector<256x128xi32>
    %3 = arith.cmpi eq, %0, %2 : vector<256x128xi32>
    %4 = arith.extui %3 : vector<256x128xi1> to vector<256x128xi32>
    %5 = arith.sitofp %4 : vector<256x128xi32> to vector<256x128xf32>
    %c0_1 = arith.constant 0 : index
    %c0_2 = arith.constant 0 : index
    %6 = vector.load %arg2[%c0_1, %c0_2] : memref<1x128xi32, #tpu.memory_space<vmem>>, vector<1x128xi32>
    %7 = vector.broadcast %6 : vector<1x128xi32> to vector<256x128xi32>
    %8 = arith.cmpi eq, %0, %7 : vector<256x128xi32>
    %9 = arith.extui %8 : vector<256x128xi1> to vector<256x128xi32>
    %10 = arith.sitofp %9 : vector<256x128xi32> to vector<256x128xf32>
    %c0_3 = arith.constant 0 : index
    %c0_4 = arith.constant 0 : index
    %11 = vector.load %arg3[%c0_3, %c0_4] : memref<128x256xf32, #tpu.memory_space<vmem>>, vector<128x256xf32>
    %cst = arith.constant dense<0.000000e+00> : vector<128x128xf32>
    %12 = tpu.matmul %11, %5, %cst {dimension_numbers = #tpu.dot_dimension_numbers<[1], [0], [0], [1], [0, 0, 1, 1], [], []>} : vector<128x256xf32>, vector<256x128xf32>, vector<128x128xf32> -> vector<128x128xf32>
    %c0_5 = arith.constant 0 : index
    %c0_6 = arith.constant 0 : index
    %13 = vector.load %arg3[%c0_5, %c0_6] : memref<128x256xf32, #tpu.memory_space<vmem>>, vector<128x256xf32>
    %cst_7 = arith.constant dense<0.000000e+00> : vector<128x128xf32>
    %14 = tpu.matmul %13, %10, %cst_7 {dimension_numbers = #tpu.dot_dimension_numbers<[1], [0], [0], [1], [0, 0, 1, 1], [], []>} : vector<128x256xf32>, vector<256x128xf32>, vector<128x128xf32> -> vector<128x128xf32>
    %15 = arith.mulf %12, %14 : vector<128x128xf32>
    %cst_8 = arith.constant dense<0.000000e+00> : vector<128xf32>
    %16 = vector.multi_reduction <add>, %15, %cst_8 [0] : vector<128x128xf32> to vector<128xf32>
    %17 = vector.shape_cast %16 : vector<128xf32> to vector<1x128xf32>
    %c0_9 = arith.constant 0 : index
    %c0_10 = arith.constant 0 : index
    %18 = vector.load %arg4[%c0_9, %c0_10] : memref<1x128xf32, #tpu.memory_space<vmem>>, vector<1x128xf32>
    tpu.vector_store %arg4[%c0_9, %c0_10], %17 {strides = array<i32>} : memref<1x128xf32, #tpu.memory_space<vmem>>, vector<1x128xf32>,
    return
  }
  func.func @transform_0(%arg0: i32) -> (i32, i32) {
    %c0_i32 = arith.constant 0 : i32
    %c0_i32_0 = arith.constant 0 : i32
    return %c0_i32, %arg0 : i32, i32
  }
  func.func @transform_1(%arg0: i32) -> (i32, i32) {
    %c0_i32 = arith.constant 0 : i32
    %c0_i32_0 = arith.constant 0 : i32
    return %c0_i32, %arg0 : i32, i32
  }
  func.func @transform_2(%arg0: i32) -> (i32, i32) {
    %c0_i32 = arith.constant 0 : i32
    %c0_i32_0 = arith.constant 0 : i32
    %c0_i32_1 = arith.constant 0 : i32
    return %c0_i32, %c0_i32_0 : i32, i32
  }
  func.func @transform_3(%arg0: i32) -> (i32, i32) {
    %c0_i32 = arith.constant 0 : i32
    %c0_i32_0 = arith.constant 0 : i32
    return %c0_i32, %arg0 : i32, i32
  }
}

</mosaic_0001>

<bundles_post_ra>
// kernel: gcn_forward.7
= control target key start
LH: loop header
LB: loop body
LE: loop exit
PB: predicated region body
PF: predicated region fallthrough
CT: control target
= control target key end

     0   :  { %s734_s1 = inlined_call_operand.vmem [shape: bf16[128,128], index: 1, kind: input, shape index: {}]   ;;  %s735_s0 = inlined_call_operand.vmem [shape: bf16[256,128], index: 0, kind: input, shape index: {}]   ;;  %s736_s2 = inlined_call_operand.vmem [shape: bf16[256,128], index: 2, kind: output, shape index: {}]  }
   0x1   :  { %v479_v0 = vld [vmem:[%s734_s1 + $0x38] sm:$0xff]  ;;  %v478_v1 = vld [vmem:[%s734_s1 + $0x30] sm:$0xff]  ;;  %v477_v2 = vld [vmem:[%s734_s1 + $0x28] sm:$0xff] }
   0x2   :  { %203 = vmatpush.bf16.msra.mxu0 %v479_v0  ;;  %575 = vmatpush.bf16.msra.mxu1 %v479_v0  ;;  %v476_v3 = vld [vmem:[%s734_s1 + $0x20] sm:$0xff]  ;;  %v475_v4 = vld [vmem:[%s734_s1 + $0x18] sm:$0xff]  ;;  %v474_v5 = vld [vmem:[%s734_s1 + $0x10] sm:$0xff] }
   0x3   :  { %576 = vmatpush.bf16.msra.mxu2 %v479_v0  ;;  %577 = vmatpush.bf16.msra.mxu3 %v479_v0  ;;  %v473_v6 = vld [vmem:[%s734_s1 + $0x8] sm:$0xff]  ;;  %v472_v7 = vld [vmem:[%s734_s1] sm:$0xff]  ;;  %v458_v16 = vld [vmem:[%s735_s0 + $0x10] sm:$0xff] }
   0x4   :  { %v456_v8 = vld [vmem:[%s735_s0] sm:$0xff]  ;;  %v457_v12 = vld [vmem:[%s735_s0 + $0x8] sm:$0xff]  ;;  %v462_v17 = vld [vmem:[%s735_s0 + $0x30] sm:$0xff] }
   0x5   :  { %v460_v9 = vld [vmem:[%s735_s0 + $0x20] sm:$0xff]  ;;  %v461_v13 = vld [vmem:[%s735_s0 + $0x28] sm:$0xff]  ;;  %v466_v18 = vld [vmem:[%s735_s0 + $0x50] sm:$0xff] }
   0x6   :  { %204 = vmatpush.bf16.msra.mxu0 %v478_v1  ;;  %578 = vmatpush.bf16.msra.mxu1 %v478_v1  ;;  %v464_v10 = vld [vmem:[%s735_s0 + $0x40] sm:$0xff]  ;;  %v465_v14 = vld [vmem:[%s735_s0 + $0x48] sm:$0xff]  ;;  %v470_v19 = vld [vmem:[%s735_s0 + $0x70] sm:$0xff] }
   0x7   :  { %579 = vmatpush.bf16.msra.mxu2 %v478_v1  ;;  %580 = vmatpush.bf16.msra.mxu3 %v478_v1  ;;  %v468_v11 = vld [vmem:[%s735_s0 + $0x60] sm:$0xff]  ;;  %v469_v15 = vld [vmem:[%s735_s0 + $0x68] sm:$0xff]  ;;  %v459_v20 = vld [vmem:[%s735_s0 + $0x18] sm:$0xff] }
   0x8   :  { %v463_v21 = vld [vmem:[%s735_s0 + $0x38] sm:$0xff] }
   0x9   :  { %v467_v22 = vld [vmem:[%s735_s0 + $0x58] sm:$0xff] }
   0xa   :  { %205 = vmatpush.bf16.msra.mxu0 %v477_v2  ;;  %581 = vmatpush.bf16.msra.mxu1 %v477_v2  ;;  %v471_v23 = vld [vmem:[%s735_s0 + $0x78] sm:$0xff] }
   0xb   :  { %582 = vmatpush.bf16.msra.mxu2 %v477_v2  ;;  %583 = vmatpush.bf16.msra.mxu3 %v477_v2 }
   0xe   :  { %206 = vmatpush.bf16.msra.mxu0 %v476_v3  ;;  %584 = vmatpush.bf16.msra.mxu1 %v476_v3 }
   0xf   :  { %585 = vmatpush.bf16.msra.mxu2 %v476_v3  ;;  %586 = vmatpush.bf16.msra.mxu3 %v476_v3 }
  0x12   :  { %207 = vmatpush.bf16.msra.mxu0 %v475_v4  ;;  %587 = vmatpush.bf16.msra.mxu1 %v475_v4 }
  0x13   :  { %588 = vmatpush.bf16.msra.mxu2 %v475_v4  ;;  %589 = vmatpush.bf16.msra.mxu3 %v475_v4 }
  0x16   :  { %208 = vmatpush.bf16.msra.mxu0 %v474_v5  ;;  %590 = vmatpush.bf16.msra.mxu1 %v474_v5 }
  0x17   :  { %591 = vmatpush.bf16.msra.mxu2 %v474_v5  ;;  %592 = vmatpush.bf16.msra.mxu3 %v474_v5 }
  0x1a   :  { %209 = vmatpush.bf16.msra.mxu0 %v473_v6  ;;  %593 = vmatpush.bf16.msra.mxu1 %v473_v6 }
  0x1b   :  { %594 = vmatpush.bf16.msra.mxu2 %v473_v6  ;;  %595 = vmatpush.bf16.msra.mxu3 %v473_v6 }
  0x1e   :  { %210 = vmatpush.bf16.msra.mxu0 %v472_v7  ;;  %596 = vmatpush.bf16.msra.mxu1 %v472_v7 }
  0x1f   :  { %597 = vmatpush.bf16.msra.mxu2 %v472_v7  ;;  %598 = vmatpush.bf16.msra.mxu3 %v472_v7 }
  0x21   :  { %211 = vmatmul.bf16.vlgmr.msra.gmra.mxu0 %v456_v8  ;;  %231 = vmatmul.bf16.vlgmr.msra.gmra.mxu1 %v460_v9 }
  0x22   :  { %251 = vmatmul.bf16.vlgmr.msra.gmra.mxu2 %v464_v10  ;;  %271 = vmatmul.bf16.vlgmr.msra.gmra.mxu3 %v468_v11 }
  0x31   :  { %216 = vmatmul.bf16.gmra.mxu0 %v457_v12  ;;  %236 = vmatmul.bf16.gmra.mxu1 %v461_v13 }
  0x32   :  { %256 = vmatmul.bf16.gmra.mxu2 %v465_v14  ;;  %276 = vmatmul.bf16.gmra.mxu3 %v469_v15 }
  0x41   :  { %221 = vmatmul.bf16.gmra.mxu0 %v458_v16  ;;  %241 = vmatmul.bf16.gmra.mxu1 %v462_v17 }
  0x42   :  { %261 = vmatmul.bf16.gmra.mxu2 %v466_v18  ;;  %281 = vmatmul.bf16.gmra.mxu3 %v470_v19 }
  0x51   :  { %226 = vmatmul.bf16.gmra.mxu0 %v459_v20  ;;  %246 = vmatmul.bf16.gmra.mxu1 %v463_v21 }
  0x52   :  { %266 = vmatmul.bf16.gmra.mxu2 %v467_v22  ;;  %286 = vmatmul.bf16.gmra.mxu3 %v471_v23 }
  0x9e   :  { %v212_v24 = vpop.f32.mrf.mxu0  ;;  %v232_v25 = vpop.f32.mrf.mxu1 }
  0xa5   :  { %v252_v26 = vpop.f32.mrf.mxu2  ;;  %v272_v27 = vpop.f32.mrf.mxu3 }
  0xa6   :  { %v214_v28 = vpop.f32.mrf.mxu0  ;;  %v234_v29 = vpop.f32.mrf.mxu1 }
  0xa7   :  { %v483_v30 = vpack.c.bf16 %v214_v28, %v212_v24  ;;  %v503_v31 = vpack.c.bf16 %v234_v29, %v232_v25 }
  0xa9   :  { %484 = vst [vmem:[%s736_s2] sm:$0xff] %v483_v30  }
  0xaa   :  { %563 = vst [vmem:[%s736_s2 + $0x20] sm:$0xff] %v503_v31  }
  0xad   :  { %v254_v32 = vpop.f32.mrf.mxu2  ;;  %v274_v33 = vpop.f32.mrf.mxu3 }
  0xae   :  { %v523_v34 = vpack.c.bf16 %v254_v32, %v252_v26  ;;  %v543_v35 = vpack.c.bf16 %v274_v33, %v272_v27  ;;  %v217_v36 = vpop.f32.mrf.mxu0  ;;  %v237_v37 = vpop.f32.mrf.mxu1 }
  0xb0   :  { %567 = vst [vmem:[%s736_s2 + $0x40] sm:$0xff] %v523_v34  }
  0xb1   :  { %571 = vst [vmem:[%s736_s2 + $0x60] sm:$0xff] %v543_v35  }
  0xb5   :  { %v257_v38 = vpop.f32.mrf.mxu2  ;;  %v277_v39 = vpop.f32.mrf.mxu3 }
  0xb6   :  { %v219_v40 = vpop.f32.mrf.mxu0  ;;  %v239_v41 = vpop.f32.mrf.mxu1 }
  0xb7   :  { %v488_v42 = vpack.c.bf16 %v219_v40, %v217_v36  ;;  %v508_v43 = vpack.c.bf16 %v239_v41, %v237_v37 }
  0xb9   :  { %560 = vst [vmem:[%s736_s2 + $0x8] sm:$0xff] %v488_v42  }
  0xba   :  { %564 = vst [vmem:[%s736_s2 + $0x28] sm:$0xff] %v508_v43  }
  0xbd   :  { %v259_v44 = vpop.f32.mrf.mxu2  ;;  %v279_v45 = vpop.f32.mrf.mxu3 }
  0xbe   :  { %v528_v46 = vpack.c.bf16 %v259_v44, %v257_v38  ;;  %v548_v47 = vpack.c.bf16 %v279_v45, %v277_v39  ;;  %v222_v48 = vpop.f32.mrf.mxu0  ;;  %v242_v49 = vpop.f32.mrf.mxu1 }
  0xc0   :  { %568 = vst [vmem:[%s736_s2 + $0x48] sm:$0xff] %v528_v46  }
  0xc1   :  { %572 = vst [vmem:[%s736_s2 + $0x68] sm:$0xff] %v548_v47  }
  0xc5   :  { %v262_v50 = vpop.f32.mrf.mxu2  ;;  %v282_v51 = vpop.f32.mrf.mxu3 }
  0xc6   :  { %v224_v52 = vpop.f32.mrf.mxu0  ;;  %v244_v53 = vpop.f32.mrf.mxu1 }
  0xc7   :  { %v493_v54 = vpack.c.bf16 %v224_v52, %v222_v48  ;;  %v513_v55 = vpack.c.bf16 %v244_v53, %v242_v49 }
  0xc9   :  { %561 = vst [vmem:[%s736_s2 + $0x10] sm:$0xff] %v493_v54  }
  0xca   :  { %565 = vst [vmem:[%s736_s2 + $0x30] sm:$0xff] %v513_v55  }
  0xcd   :  { %v264_v56 = vpop.f32.mrf.mxu2  ;;  %v284_v57 = vpop.f32.mrf.mxu3 }
  0xce   :  { %v533_v58 = vpack.c.bf16 %v264_v56, %v262_v50  ;;  %v553_v59 = vpack.c.bf16 %v284_v57, %v282_v51  ;;  %v227_v60 = vpop.f32.mrf.mxu0  ;;  %v247_v61 = vpop.f32.mrf.mxu1 }
  0xd0   :  { %569 = vst [vmem:[%s736_s2 + $0x50] sm:$0xff] %v533_v58  }
  0xd1   :  { %573 = vst [vmem:[%s736_s2 + $0x70] sm:$0xff] %v553_v59  }
  0xd5   :  { %v267_v62 = vpop.f32.mrf.mxu2  ;;  %v287_v63 = vpop.f32.mrf.mxu3 }
  0xd6   :  { %v229_v0 = vpop.f32.mrf.mxu0  ;;  %v249_v1 = vpop.f32.mrf.mxu1 }
  0xd7   :  { %v498_v2 = vpack.c.bf16 %v229_v0, %v227_v60  ;;  %v518_v3 = vpack.c.bf16 %v249_v1, %v247_v61 }
  0xd9   :  { %562 = vst [vmem:[%s736_s2 + $0x18] sm:$0xff] %v498_v2  }
  0xda   :  { %566 = vst [vmem:[%s736_s2 + $0x38] sm:$0xff] %v518_v3  }
  0xdd   :  { %v269_v4 = vpop.f32.mrf.mxu2  ;;  %v289_v5 = vpop.f32.mrf.mxu3 }
  0xde   :  { %v538_v6 = vpack.c.bf16 %v269_v4, %v267_v62  ;;  %v558_v7 = vpack.c.bf16 %v289_v5, %v287_v63 }
  0xe0   :  { %570 = vst [vmem:[%s736_s2 + $0x58] sm:$0xff] %v538_v6  }
  0xe1   :  { %574 = vst [vmem:[%s736_s2 + $0x78] sm:$0xff] %v558_v7  }

// kernel: gcn_forward.8
= control target key start
LH: loop header
LB: loop body
LE: loop exit
PB: predicated region body
PF: predicated region fallthrough
CT: control target
= control target key end

     0   :  { %s1433_s1 = inlined_call_operand.vmem [shape: bf16[256,128], index: 1, kind: input, shape index: {}]   ;;  %s1434_s0 = inlined_call_operand.vmem [shape: bf16[256,256], index: 0, kind: input, shape index: {}]   ;;  %s1435_s2 = inlined_call_operand.vmem [shape: f32[1,128], index: 2, kind: input, shape index: {}]   ;;  %s1436_s3 = inlined_call_operand.vmem [shape: f32[256,128], index: 3, kind: output, shape index: {}]  }
   0x1   :  { %v1014_v0 = vld [vmem:[%s1433_s1 + $0x38] sm:$0xff]  ;;  %v1013_v2 = vld [vmem:[%s1433_s1 + $0x30] sm:$0xff]  ;;  %v1012_v4 = vld [vmem:[%s1433_s1 + $0x28] sm:$0xff] }
   0x2   :  { %v1022_v1 = vld [vmem:[%s1433_s1 + $0x78] sm:$0xff]  ;;  %402 = vmatpush.bf16.msra.mxu0 %v1014_v0  ;;  %1023 = vmatpush.bf16.msra.mxu2 %v1014_v0  ;;  %v1021_v3 = vld [vmem:[%s1433_s1 + $0x70] sm:$0xff]  ;;  %v1020_v5 = vld [vmem:[%s1433_s1 + $0x68] sm:$0xff] }
   0x3   :  { %491 = vmatpush.bf16.msra.mxu1 %v1022_v1  ;;  %1031 = vmatpush.bf16.msra.mxu3 %v1022_v1  ;;  %v1011_v6 = vld [vmem:[%s1433_s1 + $0x20] sm:$0xff]  ;;  %v1010_v8 = vld [vmem:[%s1433_s1 + $0x18] sm:$0xff]  ;;  %v1009_v10 = vld [vmem:[%s1433_s1 + $0x10] sm:$0xff] }
   0x4   :  { %v1019_v7 = vld [vmem:[%s1433_s1 + $0x60] sm:$0xff]  ;;  %v1018_v9 = vld [vmem:[%s1433_s1 + $0x58] sm:$0xff]  ;;  %v1017_v11 = vld [vmem:[%s1433_s1 + $0x50] sm:$0xff] }
   0x5   :  { %v1008_v12 = vld [vmem:[%s1433_s1 + $0x8] sm:$0xff]  ;;  %v1007_v14 = vld [vmem:[%s1433_s1] sm:$0xff]  ;;  %v793_v28 = vld [vmem:[%s1434_s0 + $0x10] sm:$0xf] }
   0x6   :  { %403 = vmatpush.bf16.msra.mxu0 %v1013_v2  ;;  %1024 = vmatpush.bf16.msra.mxu2 %v1013_v2  ;;  %v1016_v13 = vld [vmem:[%s1433_s1 + $0x48] sm:$0xff]  ;;  %v1015_v15 = vld [vmem:[%s1433_s1 + $0x40] sm:$0xff]  ;;  %v978_v29 = vld [vmem:[%s1434_s0 + $0x14] sm:$0xf0] }
   0x7   :  { %492 = vmatpush.bf16.msra.mxu1 %v1021_v3  ;;  %1032 = vmatpush.bf16.msra.mxu3 %v1021_v3  ;;  %v785_v16 = vld [vmem:[%s1434_s0] sm:$0xf]  ;;  %v976_v17 = vld [vmem:[%s1434_s0 + $0x4] sm:$0xf0]  ;;  %v975_v20 = vld [vmem:[%s1434_s0 + $0x4] sm:$0xf]  ;;  %v794_v36 = vor.u32 %v978_v29, %v793_v28 }
   0x8   :  { %v849_v18 = vld [vmem:[%s1434_s0 + $0x80] sm:$0xf]  ;;  %v992_v19 = vld [vmem:[%s1434_s0 + $0x84] sm:$0xf0]  ;;  %v787_v21 = vld [vmem:[%s1434_s0 + $0x8] sm:$0xf0]  ;;  %v786_v24 = vor.u32 %v976_v17, %v785_v16 }
   0x9   :  { %v991_v22 = vld [vmem:[%s1434_s0 + $0x84] sm:$0xf]  ;;  %v851_v23 = vld [vmem:[%s1434_s0 + $0x88] sm:$0xf0]  ;;  %v850_v25 = vor.u32 %v992_v19, %v849_v18  ;;  %v790_v26 = vor.u32 %v975_v20, %v787_v21  ;;  %v857_v30 = vld [vmem:[%s1434_s0 + $0x90] sm:$0xf] }
   0xa   :  { %404 = vmatpush.bf16.msra.mxu0 %v1012_v4  ;;  %1025 = vmatpush.bf16.msra.mxu2 %v1012_v4  ;;  %v854_v27 = vor.u32 %v991_v22, %v851_v23  ;;  %v994_v31 = vld [vmem:[%s1434_s0 + $0x94] sm:$0xf0]  ;;  %v977_v32 = vld [vmem:[%s1434_s0 + $0x14] sm:$0xf]  ;;  %v795_v33 = vld [vmem:[%s1434_s0 + $0x18] sm:$0xf0] }
   0xb   :  { %493 = vmatpush.bf16.msra.mxu1 %v1020_v5  ;;  %1033 = vmatpush.bf16.msra.mxu3 %v1020_v5  ;;  %v993_v34 = vld [vmem:[%s1434_s0 + $0x94] sm:$0xf]  ;;  %v859_v35 = vld [vmem:[%s1434_s0 + $0x98] sm:$0xf0]  ;;  %v858_v37 = vor.u32 %v994_v31, %v857_v30  ;;  %v798_v38 = vor.u32 %v977_v32, %v795_v33  ;;  %v801_v40 = vld [vmem:[%s1434_s0 + $0x20] sm:$0xf] }
   0xc   :  { %v862_v39 = vor.u32 %v993_v34, %v859_v35  ;;  %v980_v41 = vld [vmem:[%s1434_s0 + $0x24] sm:$0xf0]  ;;  %v865_v42 = vld [vmem:[%s1434_s0 + $0xa0] sm:$0xf]  ;;  %v979_v44 = vld [vmem:[%s1434_s0 + $0x24] sm:$0xf] }
   0xd   :  { %v996_v43 = vld [vmem:[%s1434_s0 + $0xa4] sm:$0xf0]  ;;  %v803_v45 = vld [vmem:[%s1434_s0 + $0x28] sm:$0xf0]  ;;  %v995_v46 = vld [vmem:[%s1434_s0 + $0xa4] sm:$0xf]  ;;  %v802_v48 = vor.u32 %v980_v41, %v801_v40 }
   0xe   :  { %405 = vmatpush.bf16.msra.mxu0 %v1011_v6  ;;  %1026 = vmatpush.bf16.msra.mxu2 %v1011_v6  ;;  %v867_v47 = vld [vmem:[%s1434_s0 + $0xa8] sm:$0xf0]  ;;  %v866_v49 = vor.u32 %v996_v43, %v865_v42  ;;  %v806_v50 = vor.u32 %v979_v44, %v803_v45  ;;  %v809_v52 = vld [vmem:[%s1434_s0 + $0x30] sm:$0xf]  ;;  %v982_v53 = vld [vmem:[%s1434_s0 + $0x34] sm:$0xf0] }
   0xf   :  { %494 = vmatpush.bf16.msra.mxu1 %v1019_v7  ;;  %1034 = vmatpush.bf16.msra.mxu3 %v1019_v7  ;;  %v870_v51 = vor.u32 %v995_v46, %v867_v47  ;;  %v873_v54 = vld [vmem:[%s1434_s0 + $0xb0] sm:$0xf]  ;;  %v998_v55 = vld [vmem:[%s1434_s0 + $0xb4] sm:$0xf0]  ;;  %v981_v56 = vld [vmem:[%s1434_s0 + $0x34] sm:$0xf]  ;;  %v810_v60 = vor.u32 %v982_v53, %v809_v52 }
  0x10   :  { %v811_v57 = vld [vmem:[%s1434_s0 + $0x38] sm:$0xf0]  ;;  %v997_v58 = vld [vmem:[%s1434_s0 + $0xb4] sm:$0xf]  ;;  %v874_v61 = vor.u32 %v998_v55, %v873_v54  ;;  %v817_v0 = vld [vmem:[%s1434_s0 + $0x40] sm:$0xf] }
  0x11   :  { %v875_v59 = vld [vmem:[%s1434_s0 + $0xb8] sm:$0xf0]  ;;  %v814_v62 = vor.u32 %v981_v56, %v811_v57  ;;  %v984_v1 = vld [vmem:[%s1434_s0 + $0x44] sm:$0xf0]  ;;  %v881_v2 = vld [vmem:[%s1434_s0 + $0xc0] sm:$0xf] }
  0x12   :  { %406 = vmatpush.bf16.msra.mxu0 %v1010_v8  ;;  %1027 = vmatpush.bf16.msra.mxu2 %v1010_v8  ;;  %v878_v63 = vor.u32 %v997_v58, %v875_v59  ;;  %v1000_v3 = vld [vmem:[%s1434_s0 + $0xc4] sm:$0xf0]  ;;  %v983_v4 = vld [vmem:[%s1434_s0 + $0x44] sm:$0xf]  ;;  %v819_v5 = vld [vmem:[%s1434_s0 + $0x48] sm:$0xf0]  ;;  %v818_v8 = vor.u32 %v984_v1, %v817_v0 }
  0x13   :  { %495 = vmatpush.bf16.msra.mxu1 %v1018_v9  ;;  %1035 = vmatpush.bf16.msra.mxu3 %v1018_v9  ;;  %v999_v6 = vld [vmem:[%s1434_s0 + $0xc4] sm:$0xf]  ;;  %v883_v7 = vld [vmem:[%s1434_s0 + $0xc8] sm:$0xf0]  ;;  %v882_v9 = vor.u32 %v1000_v3, %v881_v2  ;;  %v985_v16 = vld [vmem:[%s1434_s0 + $0x54] sm:$0xf] }
  0x14   :  { %v827_v17 = vld [vmem:[%s1434_s0 + $0x58] sm:$0xf0]  ;;  %v1001_v18 = vld [vmem:[%s1434_s0 + $0xd4] sm:$0xf]  ;;  %v987_v28 = vld [vmem:[%s1434_s0 + $0x64] sm:$0xf] }
  0x15   :  { %v891_v19 = vld [vmem:[%s1434_s0 + $0xd8] sm:$0xf0]  ;;  %v830_v22 = vor.u32 %v985_v16, %v827_v17  ;;  %v835_v29 = vld [vmem:[%s1434_s0 + $0x68] sm:$0xf0]  ;;  %v1003_v30 = vld [vmem:[%s1434_s0 + $0xe4] sm:$0xf] }
  0x16   :  { %407 = vmatpush.bf16.msra.mxu0 %v1009_v10  ;;  %1028 = vmatpush.bf16.msra.mxu2 %v1009_v10  ;;  %v822_v10 = vor.u32 %v983_v4, %v819_v5  ;;  %v894_v23 = vor.u32 %v1001_v18, %v891_v19  ;;  %v899_v31 = vld [vmem:[%s1434_s0 + $0xe8] sm:$0xf0]  ;;  %v838_v34 = vor.u32 %v987_v28, %v835_v29  ;;  %v989_v40 = vld [vmem:[%s1434_s0 + $0x74] sm:$0xf]  ;;  %v843_v41 = vld [vmem:[%s1434_s0 + $0x78] sm:$0xf0] }
  0x17   :  { %496 = vmatpush.bf16.msra.mxu1 %v1017_v11  ;;  %1036 = vmatpush.bf16.msra.mxu3 %v1017_v11  ;;  %v886_v11 = vor.u32 %v999_v6, %v883_v7  ;;  %v902_v35 = vor.u32 %v1003_v30, %v899_v31  ;;  %v1005_v42 = vld [vmem:[%s1434_s0 + $0xf4] sm:$0xf]  ;;  %v907_v43 = vld [vmem:[%s1434_s0 + $0xf8] sm:$0xf0]  ;;  %v846_v46 = vor.u32 %v989_v40, %v843_v41 }
  0x18   :  { %v910_v47 = vor.u32 %v1005_v42, %v907_v43 }
  0x1a   :  { %408 = vmatpush.bf16.msra.mxu0 %v1008_v12  ;;  %1029 = vmatpush.bf16.msra.mxu2 %v1008_v12  ;;  %v825_v12 = vld [vmem:[%s1434_s0 + $0x50] sm:$0xf] }
  0x1b   :  { %497 = vmatpush.bf16.msra.mxu1 %v1016_v13  ;;  %1037 = vmatpush.bf16.msra.mxu3 %v1016_v13  ;;  %v986_v13 = vld [vmem:[%s1434_s0 + $0x54] sm:$0xf0] }
  0x1c   :  { %v826_v20 = vor.u32 %v986_v13, %v825_v12 }
  0x1e   :  { %409 = vmatpush.bf16.msra.mxu0 %v1007_v14  ;;  %1030 = vmatpush.bf16.msra.mxu2 %v1007_v14  ;;  %v889_v14 = vld [vmem:[%s1434_s0 + $0xd0] sm:$0xf] }
  0x1f   :  { %498 = vmatpush.bf16.msra.mxu1 %v1015_v15  ;;  %1038 = vmatpush.bf16.msra.mxu3 %v1015_v15  ;;  %v1002_v15 = vld [vmem:[%s1434_s0 + $0xd4] sm:$0xf0] }
  0x20   :  { %v890_v21 = vor.u32 %v1002_v15, %v889_v14 }
  0x21   :  { %410 = vmatmul.bf16.vlgmr.msra.gmra.mxu0 %v786_v24  ;;  %450 = vmatmul.bf16.vlgmr.msra.gmra.mxu2 %v850_v25  ;;  %v833_v24 = vld [vmem:[%s1434_s0 + $0x60] sm:$0xf]  ;;  %v988_v25 = vld [vmem:[%s1434_s0 + $0x64] sm:$0xf0] }
  0x22   :  { %499 = vmatmul.bf16.vlgmr.msra.gmra.mxu1 %v790_v26  ;;  %539 = vmatmul.bf16.vlgmr.msra.gmra.mxu3 %v854_v27  ;;  %v897_v26 = vld [vmem:[%s1434_s0 + $0xe0] sm:$0xf]  ;;  %v1004_v27 = vld [vmem:[%s1434_s0 + $0xe4] sm:$0xf0]  ;;  %v834_v32 = vor.u32 %v988_v25, %v833_v24 }
  0x23   :  { %v898_v33 = vor.u32 %v1004_v27, %v897_v26 }
  0x31   :  { %415 = vmatmul.bf16.gmra.mxu0 %v794_v36  ;;  %455 = vmatmul.bf16.gmra.mxu2 %v858_v37  ;;  %v841_v36 = vld [vmem:[%s1434_s0 + $0x70] sm:$0xf]  ;;  %v990_v37 = vld [vmem:[%s1434_s0 + $0x74] sm:$0xf0] }
  0x32   :  { %504 = vmatmul.bf16.gmra.mxu1 %v798_v38  ;;  %544 = vmatmul.bf16.gmra.mxu3 %v862_v39  ;;  %v905_v38 = vld [vmem:[%s1434_s0 + $0xf0] sm:$0xf]  ;;  %v1006_v39 = vld [vmem:[%s1434_s0 + $0xf4] sm:$0xf0]  ;;  %v842_v44 = vor.u32 %v990_v37, %v841_v36 }
  0x33   :  { %v906_v45 = vor.u32 %v1006_v39, %v905_v38 }
  0x41   :  { %420 = vmatmul.bf16.gmra.mxu0 %v802_v48  ;;  %460 = vmatmul.bf16.gmra.mxu2 %v866_v49  ;;  %v1303_v49 = vld [vmem:[%s1435_s2] ss:$0 sm:$0xff] }
  0x42   :  { %509 = vmatmul.bf16.gmra.mxu1 %v806_v50  ;;  %549 = vmatmul.bf16.gmra.mxu3 %v870_v51 }
  0x51   :  { %425 = vmatmul.bf16.gmra.mxu0 %v810_v60  ;;  %465 = vmatmul.bf16.gmra.mxu2 %v874_v61 }
  0x52   :  { %514 = vmatmul.bf16.gmra.mxu1 %v814_v62  ;;  %554 = vmatmul.bf16.gmra.mxu3 %v878_v63 }
  0x61   :  { %430 = vmatmul.bf16.gmra.mxu0 %v818_v8  ;;  %470 = vmatmul.bf16.gmra.mxu2 %v882_v9 }
  0x62   :  { %519 = vmatmul.bf16.gmra.mxu1 %v822_v10  ;;  %559 = vmatmul.bf16.gmra.mxu3 %v886_v11 }
  0x71   :  { %435 = vmatmul.bf16.gmra.mxu0 %v826_v20  ;;  %475 = vmatmul.bf16.gmra.mxu2 %v890_v21 }
  0x72   :  { %524 = vmatmul.bf16.gmra.mxu1 %v830_v22  ;;  %564 = vmatmul.bf16.gmra.mxu3 %v894_v23 }
  0x81   :  { %440 = vmatmul.bf16.gmra.mxu0 %v834_v32  ;;  %480 = vmatmul.bf16.gmra.mxu2 %v898_v33 }
  0x82   :  { %529 = vmatmul.bf16.gmra.mxu1 %v838_v34  ;;  %569 = vmatmul.bf16.gmra.mxu3 %v902_v35 }
  0x91   :  { %445 = vmatmul.bf16.gmra.mxu0 %v842_v44  ;;  %485 = vmatmul.bf16.gmra.mxu2 %v906_v45 }
  0x92   :  { %534 = vmatmul.bf16.gmra.mxu1 %v846_v46  ;;  %574 = vmatmul.bf16.gmra.mxu3 %v910_v47 }
  0x9e   :  { %v411_v48 = vpop.f32.mrf.mxu0 }
  0x9f   :  { %v500_v50 = vpop.f32.mrf.mxu1 }
  0xa0   :  { %v501_v51 = vadd.f32 %v500_v50, %v411_v48 }
  0xa2   :  { %v683_v52 = vadd.f32 %v1303_v49, %v501_v51 }
  0xa4   :  { %v715_v53 = vmax.f32 %v683_v52, 0.0  ;;  %v451_v54 = vpop.f32.mrf.mxu2 }
  0xa5   :  { %v540_v55 = vpop.f32.mrf.mxu3 }
  0xa6   :  { %747 = vst [vmem:[%s1436_s3] sm:$0xff] %v715_v53  ;;  %v541_v56 = vadd.f32 %v540_v55, %v451_v54  ;;  %v413_v57 = vpop.f32.mrf.mxu0 }
  0xa7   :  { %v502_v58 = vpop.f32.mrf.mxu1 }
  0xa8   :  { %v699_v59 = vadd.f32 %v1303_v49, %v541_v56  ;;  %v503_v60 = vadd.f32 %v502_v58, %v413_v57 }
  0xaa   :  { %v731_v61 = vmax.f32 %v699_v59, 0.0  ;;  %v684_v62 = vadd.f32 %v1303_v49, %v503_v60 }
  0xac   :  { %763 = vst [vmem:[%s1436_s3 + $0x80] sm:$0xff] %v731_v61  ;;  %v716_v63 = vmax.f32 %v684_v62, 0.0  ;;  %v453_v0 = vpop.f32.mrf.mxu2 }
  0xad   :  { %v542_v1 = vpop.f32.mrf.mxu3 }
  0xae   :  { %748 = vst [vmem:[%s1436_s3 + $0x8] sm:$0xff] %v716_v63  ;;  %v543_v2 = vadd.f32 %v542_v1, %v453_v0  ;;  %v416_v3 = vpop.f32.mrf.mxu0 }
  0xaf   :  { %v505_v4 = vpop.f32.mrf.mxu1 }
  0xb0   :  { %v700_v5 = vadd.f32 %v1303_v49, %v543_v2  ;;  %v506_v6 = vadd.f32 %v505_v4, %v416_v3 }
  0xb2   :  { %v732_v7 = vmax.f32 %v700_v5, 0.0  ;;  %v685_v8 = vadd.f32 %v1303_v49, %v506_v6 }
  0xb4   :  { %764 = vst [vmem:[%s1436_s3 + $0x88] sm:$0xff] %v732_v7  ;;  %v717_v9 = vmax.f32 %v685_v8, 0.0  ;;  %v456_v10 = vpop.f32.mrf.mxu2 }
  0xb5   :  { %v545_v11 = vpop.f32.mrf.mxu3 }
  0xb6   :  { %749 = vst [vmem:[%s1436_s3 + $0x10] sm:$0xff] %v717_v9  ;;  %v546_v12 = vadd.f32 %v545_v11, %v456_v10  ;;  %v418_v13 = vpop.f32.mrf.mxu0 }
  0xb7   :  { %v507_v14 = vpop.f32.mrf.mxu1 }
  0xb8   :  { %v701_v15 = vadd.f32 %v1303_v49, %v546_v12  ;;  %v508_v16 = vadd.f32 %v507_v14, %v418_v13 }
  0xba   :  { %v733_v17 = vmax.f32 %v701_v15, 0.0  ;;  %v686_v18 = vadd.f32 %v1303_v49, %v508_v16 }
  0xbc   :  { %765 = vst [vmem:[%s1436_s3 + $0x90] sm:$0xff] %v733_v17  ;;  %v718_v19 = vmax.f32 %v686_v18, 0.0  ;;  %v458_v20 = vpop.f32.mrf.mxu2 }
  0xbd   :  { %v547_v21 = vpop.f32.mrf.mxu3 }
  0xbe   :  { %750 = vst [vmem:[%s1436_s3 + $0x18] sm:$0xff] %v718_v19  ;;  %v548_v22 = vadd.f32 %v547_v21, %v458_v20  ;;  %v421_v23 = vpop.f32.mrf.mxu0 }
  0xbf   :  { %v510_v24 = vpop.f32.mrf.mxu1 }
  0xc0   :  { %v702_v25 = vadd.f32 %v1303_v49, %v548_v22  ;;  %v511_v26 = vadd.f32 %v510_v24, %v421_v23 }
  0xc2   :  { %v734_v27 = vmax.f32 %v702_v25, 0.0  ;;  %v687_v28 = vadd.f32 %v1303_v49, %v511_v26 }
  0xc4   :  { %766 = vst [vmem:[%s1436_s3 + $0x98] sm:$0xff] %v734_v27  ;;  %v719_v29 = vmax.f32 %v687_v28, 0.0  ;;  %v461_v30 = vpop.f32.mrf.mxu2 }
  0xc5   :  { %v550_v31 = vpop.f32.mrf.mxu3 }
  0xc6   :  { %751 = vst [vmem:[%s1436_s3 + $0x20] sm:$0xff] %v719_v29  ;;  %v551_v32 = vadd.f32 %v550_v31, %v461_v30  ;;  %v423_v33 = vpop.f32.mrf.mxu0 }
  0xc7   :  { %v512_v34 = vpop.f32.mrf.mxu1 }
  0xc8   :  { %v703_v35 = vadd.f32 %v1303_v49, %v551_v32  ;;  %v513_v36 = vadd.f32 %v512_v34, %v423_v33 }
  0xca   :  { %v735_v37 = vmax.f32 %v703_v35, 0.0  ;;  %v688_v38 = vadd.f32 %v1303_v49, %v513_v36 }
  0xcc   :  { %767 = vst [vmem:[%s1436_s3 + $0xa0] sm:$0xff] %v735_v37  ;;  %v720_v39 = vmax.f32 %v688_v38, 0.0  ;;  %v463_v40 = vpop.f32.mrf.mxu2 }
  0xcd   :  { %v552_v41 = vpop.f32.mrf.mxu3 }
  0xce   :  { %752 = vst [vmem:[%s1436_s3 + $0x28] sm:$0xff] %v720_v39  ;;  %v553_v42 = vadd.f32 %v552_v41, %v463_v40  ;;  %v426_v43 = vpop.f32.mrf.mxu0 }
  0xcf   :  { %v515_v44 = vpop.f32.mrf.mxu1 }
  0xd0   :  { %v704_v45 = vadd.f32 %v1303_v49, %v553_v42  ;;  %v516_v46 = vadd.f32 %v515_v44, %v426_v43 }
  0xd2   :  { %v736_v47 = vmax.f32 %v704_v45, 0.0  ;;  %v689_v48 = vadd.f32 %v1303_v49, %v516_v46 }
  0xd4   :  { %768 = vst [vmem:[%s1436_s3 + $0xa8] sm:$0xff] %v736_v47  ;;  %v721_v50 = vmax.f32 %v689_v48, 0.0  ;;  %v466_v51 = vpop.f32.mrf.mxu2 }
  0xd5   :  { %v555_v52 = vpop.f32.mrf.mxu3 }
  0xd6   :  { %753 = vst [vmem:[%s1436_s3 + $0x30] sm:$0xff] %v721_v50  ;;  %v556_v53 = vadd.f32 %v555_v52, %v466_v51  ;;  %v428_v54 = vpop.f32.mrf.mxu0 }
  0xd7   :  { %v517_v55 = vpop.f32.mrf.mxu1 }
  0xd8   :  { %v705_v56 = vadd.f32 %v1303_v49, %v556_v53  ;;  %v518_v57 = vadd.f32 %v517_v55, %v428_v54 }
  0xda   :  { %v737_v58 = vmax.f32 %v705_v56, 0.0  ;;  %v690_v59 = vadd.f32 %v1303_v49, %v518_v57 }
  0xdc   :  { %769 = vst [vmem:[%s1436_s3 + $0xb0] sm:$0xff] %v737_v58  ;;  %v722_v60 = vmax.f32 %v690_v59, 0.0  ;;  %v468_v61 = vpop.f32.mrf.mxu2 }
  0xdd   :  { %v557_v62 = vpop.f32.mrf.mxu3 }
  0xde   :  { %754 = vst [vmem:[%s1436_s3 + $0x38] sm:$0xff] %v722_v60  ;;  %v558_v63 = vadd.f32 %v557_v62, %v468_v61  ;;  %v431_v0 = vpop.f32.mrf.mxu0 }
  0xdf   :  { %v520_v1 = vpop.f32.mrf.mxu1 }
  0xe0   :  { %v706_v2 = vadd.f32 %v1303_v49, %v558_v63  ;;  %v521_v3 = vadd.f32 %v520_v1, %v431_v0 }
  0xe2   :  { %v738_v4 = vmax.f32 %v706_v2, 0.0  ;;  %v691_v5 = vadd.f32 %v1303_v49, %v521_v3 }
  0xe4   :  { %770 = vst [vmem:[%s1436_s3 + $0xb8] sm:$0xff] %v738_v4  ;;  %v723_v6 = vmax.f32 %v691_v5, 0.0  ;;  %v471_v7 = vpop.f32.mrf.mxu2 }
  0xe5   :  { %v560_v8 = vpop.f32.mrf.mxu3 }
  0xe6   :  { %755 = vst [vmem:[%s1436_s3 + $0x40] sm:$0xff] %v723_v6  ;;  %v561_v9 = vadd.f32 %v560_v8, %v471_v7  ;;  %v433_v10 = vpop.f32.mrf.mxu0 }
  0xe7   :  { %v522_v11 = vpop.f32.mrf.mxu1 }
  0xe8   :  { %v707_v12 = vadd.f32 %v1303_v49, %v561_v9  ;;  %v523_v13 = vadd.f32 %v522_v11, %v433_v10 }
  0xea   :  { %v739_v14 = vmax.f32 %v707_v12, 0.0  ;;  %v692_v15 = vadd.f32 %v1303_v49, %v523_v13 }
  0xec   :  { %771 = vst [vmem:[%s1436_s3 + $0xc0] sm:$0xff] %v739_v14  ;;  %v724_v16 = vmax.f32 %v692_v15, 0.0  ;;  %v473_v17 = vpop.f32.mrf.mxu2 }
  0xed   :  { %v562_v18 = vpop.f32.mrf.mxu3 }
  0xee   :  { %756 = vst [vmem:[%s1436_s3 + $0x48] sm:$0xff] %v724_v16  ;;  %v563_v19 = vadd.f32 %v562_v18, %v473_v17  ;;  %v436_v20 = vpop.f32.mrf.mxu0 }
  0xef   :  { %v525_v21 = vpop.f32.mrf.mxu1 }
  0xf0   :  { %v708_v22 = vadd.f32 %v1303_v49, %v563_v19  ;;  %v526_v23 = vadd.f32 %v525_v21, %v436_v20 }
  0xf2   :  { %v740_v24 = vmax.f32 %v708_v22, 0.0  ;;  %v693_v25 = vadd.f32 %v1303_v49, %v526_v23 }
  0xf4   :  { %772 = vst [vmem:[%s1436_s3 + $0xc8] sm:$0xff] %v740_v24  ;;  %v725_v26 = vmax.f32 %v693_v25, 0.0  ;;  %v476_v27 = vpop.f32.mrf.mxu2 }
  0xf5   :  { %v565_v28 = vpop.f32.mrf.mxu3 }
  0xf6   :  { %757 = vst [vmem:[%s1436_s3 + $0x50] sm:$0xff] %v725_v26  ;;  %v566_v29 = vadd.f32 %v565_v28, %v476_v27  ;;  %v438_v30 = vpop.f32.mrf.mxu0 }
  0xf7   :  { %v527_v31 = vpop.f32.mrf.mxu1 }
  0xf8   :  { %v709_v32 = vadd.f32 %v1303_v49, %v566_v29  ;;  %v528_v33 = vadd.f32 %v527_v31, %v438_v30 }
  0xfa   :  { %v741_v34 = vmax.f32 %v709_v32, 0.0  ;;  %v694_v35 = vadd.f32 %v1303_v49, %v528_v33 }
  0xfc   :  { %773 = vst [vmem:[%s1436_s3 + $0xd0] sm:$0xff] %v741_v34  ;;  %v726_v36 = vmax.f32 %v694_v35, 0.0  ;;  %v478_v37 = vpop.f32.mrf.mxu2 }
  0xfd   :  { %v567_v38 = vpop.f32.mrf.mxu3 }
  0xfe   :  { %758 = vst [vmem:[%s1436_s3 + $0x58] sm:$0xff] %v726_v36  ;;  %v568_v39 = vadd.f32 %v567_v38, %v478_v37  ;;  %v441_v40 = vpop.f32.mrf.mxu0 }
  0xff   :  { %v530_v41 = vpop.f32.mrf.mxu1 }
 0x100   :  { %v710_v42 = vadd.f32 %v1303_v49, %v568_v39  ;;  %v531_v43 = vadd.f32 %v530_v41, %v441_v40 }
 0x102   :  { %v742_v44 = vmax.f32 %v710_v42, 0.0  ;;  %v695_v45 = vadd.f32 %v1303_v49, %v531_v43 }
 0x104   :  { %774 = vst [vmem:[%s1436_s3 + $0xd8] sm:$0xff] %v742_v44  ;;  %v727_v46 = vmax.f32 %v695_v45, 0.0  ;;  %v481_v47 = vpop.f32.mrf.mxu2 }
 0x105   :  { %v570_v48 = vpop.f32.mrf.mxu3 }
 0x106   :  { %759 = vst [vmem:[%s1436_s3 + $0x60] sm:$0xff] %v727_v46  ;;  %v571_v50 = vadd.f32 %v570_v48, %v481_v47  ;;  %v443_v51 = vpop.f32.mrf.mxu0 }
 0x107   :  { %v532_v52 = vpop.f32.mrf.mxu1 }
 0x108   :  { %v711_v53 = vadd.f32 %v1303_v49, %v571_v50  ;;  %v533_v54 = vadd.f32 %v532_v52, %v443_v51 }
 0x10a   :  { %v743_v55 = vmax.f32 %v711_v53, 0.0  ;;  %v696_v56 = vadd.f32 %v1303_v49, %v533_v54 }
 0x10c   :  { %775 = vst [vmem:[%s1436_s3 + $0xe0] sm:$0xff] %v743_v55  ;;  %v728_v57 = vmax.f32 %v696_v56, 0.0  ;;  %v483_v58 = vpop.f32.mrf.mxu2 }
 0x10d   :  { %v572_v59 = vpop.f32.mrf.mxu3 }
 0x10e   :  { %760 = vst [vmem:[%s1436_s3 + $0x68] sm:$0xff] %v728_v57  ;;  %v573_v60 = vadd.f32 %v572_v59, %v483_v58  ;;  %v446_v61 = vpop.f32.mrf.mxu0 }
 0x10f   :  { %v535_v62 = vpop.f32.mrf.mxu1 }
 0x110   :  { %v712_v63 = vadd.f32 %v1303_v49, %v573_v60  ;;  %v536_v0 = vadd.f32 %v535_v62, %v446_v61 }
 0x112   :  { %v744_v1 = vmax.f32 %v712_v63, 0.0  ;;  %v697_v2 = vadd.f32 %v1303_v49, %v536_v0 }
 0x114   :  { %776 = vst [vmem:[%s1436_s3 + $0xe8] sm:$0xff] %v744_v1  ;;  %v729_v3 = vmax.f32 %v697_v2, 0.0  ;;  %v486_v4 = vpop.f32.mrf.mxu2 }
 0x115   :  { %v575_v5 = vpop.f32.mrf.mxu3 }
 0x116   :  { %761 = vst [vmem:[%s1436_s3 + $0x70] sm:$0xff] %v729_v3  ;;  %v576_v6 = vadd.f32 %v575_v5, %v486_v4  ;;  %v448_v7 = vpop.f32.mrf.mxu0 }
 0x117   :  { %v537_v8 = vpop.f32.mrf.mxu1 }
 0x118   :  { %v713_v9 = vadd.f32 %v1303_v49, %v576_v6  ;;  %v538_v10 = vadd.f32 %v537_v8, %v448_v7 }
 0x11a   :  { %v745_v11 = vmax.f32 %v713_v9, 0.0  ;;  %v698_v12 = vadd.f32 %v1303_v49, %v538_v10 }
 0x11c   :  { %777 = vst [vmem:[%s1436_s3 + $0xf0] sm:$0xff] %v745_v11  ;;  %v730_v13 = vmax.f32 %v698_v12, 0.0  ;;  %v488_v14 = vpop.f32.mrf.mxu2 }
 0x11d   :  { %v577_v15 = vpop.f32.mrf.mxu3 }
 0x11e   :  { %762 = vst [vmem:[%s1436_s3 + $0x78] sm:$0xff] %v730_v13  ;;  %v578_v16 = vadd.f32 %v577_v15, %v488_v14 }
 0x120   :  { %v714_v17 = vadd.f32 %v1303_v49, %v578_v16 }
 0x122   :  { %v746_v18 = vmax.f32 %v714_v17, 0.0 }
 0x124   :  { %778 = vst [vmem:[%s1436_s3 + $0xf8] sm:$0xff] %v746_v18 }

// kernel: gcn_forward.12
= control target key start
LH: loop header
LB: loop body
LE: loop exit
PB: predicated region body
PF: predicated region fallthrough
CT: control target
= control target key end

     0   :  { %s1401_s1 = inlined_call_operand.vmem [shape: bf16[256,128], index: 1, kind: input, shape index: {}]   ;;  %s1402_s0 = inlined_call_operand.vmem [shape: bf16[256,256], index: 0, kind: input, shape index: {}]   ;;  %s1403_s2 = inlined_call_operand.vmem [shape: f32[1,128], index: 2, kind: input, shape index: {}]   ;;  %s1404_s3 = inlined_call_operand.vmem [shape: f32[256,128], index: 3, kind: output, shape index: {}]  }
   0x1   :  { %v982_v0 = vld [vmem:[%s1401_s1 + $0x38] sm:$0xff]  ;;  %v981_v2 = vld [vmem:[%s1401_s1 + $0x30] sm:$0xff]  ;;  %v980_v4 = vld [vmem:[%s1401_s1 + $0x28] sm:$0xff] }
   0x2   :  { %v990_v1 = vld [vmem:[%s1401_s1 + $0x78] sm:$0xff]  ;;  %402 = vmatpush.bf16.msra.mxu0 %v982_v0  ;;  %991 = vmatpush.bf16.msra.mxu2 %v982_v0  ;;  %v989_v3 = vld [vmem:[%s1401_s1 + $0x70] sm:$0xff]  ;;  %v988_v5 = vld [vmem:[%s1401_s1 + $0x68] sm:$0xff] }
   0x3   :  { %491 = vmatpush.bf16.msra.mxu1 %v990_v1  ;;  %999 = vmatpush.bf16.msra.mxu3 %v990_v1  ;;  %v979_v6 = vld [vmem:[%s1401_s1 + $0x20] sm:$0xff]  ;;  %v978_v8 = vld [vmem:[%s1401_s1 + $0x18] sm:$0xff]  ;;  %v977_v10 = vld [vmem:[%s1401_s1 + $0x10] sm:$0xff] }
   0x4   :  { %v987_v7 = vld [vmem:[%s1401_s1 + $0x60] sm:$0xff]  ;;  %v986_v9 = vld [vmem:[%s1401_s1 + $0x58] sm:$0xff]  ;;  %v985_v11 = vld [vmem:[%s1401_s1 + $0x50] sm:$0xff] }
   0x5   :  { %v976_v12 = vld [vmem:[%s1401_s1 + $0x8] sm:$0xff]  ;;  %v975_v14 = vld [vmem:[%s1401_s1] sm:$0xff]  ;;  %v761_v28 = vld [vmem:[%s1402_s0 + $0x10] sm:$0xf] }
   0x6   :  { %403 = vmatpush.bf16.msra.mxu0 %v981_v2  ;;  %992 = vmatpush.bf16.msra.mxu2 %v981_v2  ;;  %v984_v13 = vld [vmem:[%s1401_s1 + $0x48] sm:$0xff]  ;;  %v983_v15 = vld [vmem:[%s1401_s1 + $0x40] sm:$0xff]  ;;  %v946_v29 = vld [vmem:[%s1402_s0 + $0x14] sm:$0xf0] }
   0x7   :  { %492 = vmatpush.bf16.msra.mxu1 %v989_v3  ;;  %1000 = vmatpush.bf16.msra.mxu3 %v989_v3  ;;  %v753_v16 = vld [vmem:[%s1402_s0] sm:$0xf]  ;;  %v944_v17 = vld [vmem:[%s1402_s0 + $0x4] sm:$0xf0]  ;;  %v943_v20 = vld [vmem:[%s1402_s0 + $0x4] sm:$0xf]  ;;  %v762_v36 = vor.u32 %v946_v29, %v761_v28 }
   0x8   :  { %v817_v18 = vld [vmem:[%s1402_s0 + $0x80] sm:$0xf]  ;;  %v960_v19 = vld [vmem:[%s1402_s0 + $0x84] sm:$0xf0]  ;;  %v755_v21 = vld [vmem:[%s1402_s0 + $0x8] sm:$0xf0]  ;;  %v754_v24 = vor.u32 %v944_v17, %v753_v16 }
   0x9   :  { %v959_v22 = vld [vmem:[%s1402_s0 + $0x84] sm:$0xf]  ;;  %v819_v23 = vld [vmem:[%s1402_s0 + $0x88] sm:$0xf0]  ;;  %v818_v25 = vor.u32 %v960_v19, %v817_v18  ;;  %v758_v26 = vor.u32 %v943_v20, %v755_v21  ;;  %v825_v30 = vld [vmem:[%s1402_s0 + $0x90] sm:$0xf] }
   0xa   :  { %404 = vmatpush.bf16.msra.mxu0 %v980_v4  ;;  %993 = vmatpush.bf16.msra.mxu2 %v980_v4  ;;  %v822_v27 = vor.u32 %v959_v22, %v819_v23  ;;  %v962_v31 = vld [vmem:[%s1402_s0 + $0x94] sm:$0xf0]  ;;  %v945_v32 = vld [vmem:[%s1402_s0 + $0x14] sm:$0xf]  ;;  %v763_v33 = vld [vmem:[%s1402_s0 + $0x18] sm:$0xf0] }
   0xb   :  { %493 = vmatpush.bf16.msra.mxu1 %v988_v5  ;;  %1001 = vmatpush.bf16.msra.mxu3 %v988_v5  ;;  %v961_v34 = vld [vmem:[%s1402_s0 + $0x94] sm:$0xf]  ;;  %v827_v35 = vld [vmem:[%s1402_s0 + $0x98] sm:$0xf0]  ;;  %v826_v37 = vor.u32 %v962_v31, %v825_v30  ;;  %v766_v38 = vor.u32 %v945_v32, %v763_v33  ;;  %v769_v40 = vld [vmem:[%s1402_s0 + $0x20] sm:$0xf] }
   0xc   :  { %v830_v39 = vor.u32 %v961_v34, %v827_v35  ;;  %v948_v41 = vld [vmem:[%s1402_s0 + $0x24] sm:$0xf0]  ;;  %v833_v42 = vld [vmem:[%s1402_s0 + $0xa0] sm:$0xf]  ;;  %v947_v44 = vld [vmem:[%s1402_s0 + $0x24] sm:$0xf] }
   0xd   :  { %v964_v43 = vld [vmem:[%s1402_s0 + $0xa4] sm:$0xf0]  ;;  %v771_v45 = vld [vmem:[%s1402_s0 + $0x28] sm:$0xf0]  ;;  %v963_v46 = vld [vmem:[%s1402_s0 + $0xa4] sm:$0xf]  ;;  %v770_v48 = vor.u32 %v948_v41, %v769_v40 }
   0xe   :  { %405 = vmatpush.bf16.msra.mxu0 %v979_v6  ;;  %994 = vmatpush.bf16.msra.mxu2 %v979_v6  ;;  %v835_v47 = vld [vmem:[%s1402_s0 + $0xa8] sm:$0xf0]  ;;  %v834_v49 = vor.u32 %v964_v43, %v833_v42  ;;  %v774_v50 = vor.u32 %v947_v44, %v771_v45  ;;  %v777_v52 = vld [vmem:[%s1402_s0 + $0x30] sm:$0xf]  ;;  %v950_v53 = vld [vmem:[%s1402_s0 + $0x34] sm:$0xf0] }
   0xf   :  { %494 = vmatpush.bf16.msra.mxu1 %v987_v7  ;;  %1002 = vmatpush.bf16.msra.mxu3 %v987_v7  ;;  %v838_v51 = vor.u32 %v963_v46, %v835_v47  ;;  %v841_v54 = vld [vmem:[%s1402_s0 + $0xb0] sm:$0xf]  ;;  %v966_v55 = vld [vmem:[%s1402_s0 + $0xb4] sm:$0xf0]  ;;  %v949_v56 = vld [vmem:[%s1402_s0 + $0x34] sm:$0xf]  ;;  %v778_v60 = vor.u32 %v950_v53, %v777_v52 }
  0x10   :  { %v779_v57 = vld [vmem:[%s1402_s0 + $0x38] sm:$0xf0]  ;;  %v965_v58 = vld [vmem:[%s1402_s0 + $0xb4] sm:$0xf]  ;;  %v842_v61 = vor.u32 %v966_v55, %v841_v54  ;;  %v785_v0 = vld [vmem:[%s1402_s0 + $0x40] sm:$0xf] }
  0x11   :  { %v843_v59 = vld [vmem:[%s1402_s0 + $0xb8] sm:$0xf0]  ;;  %v782_v62 = vor.u32 %v949_v56, %v779_v57  ;;  %v952_v1 = vld [vmem:[%s1402_s0 + $0x44] sm:$0xf0]  ;;  %v849_v2 = vld [vmem:[%s1402_s0 + $0xc0] sm:$0xf] }
  0x12   :  { %406 = vmatpush.bf16.msra.mxu0 %v978_v8  ;;  %995 = vmatpush.bf16.msra.mxu2 %v978_v8  ;;  %v846_v63 = vor.u32 %v965_v58, %v843_v59  ;;  %v968_v3 = vld [vmem:[%s1402_s0 + $0xc4] sm:$0xf0]  ;;  %v951_v4 = vld [vmem:[%s1402_s0 + $0x44] sm:$0xf]  ;;  %v787_v5 = vld [vmem:[%s1402_s0 + $0x48] sm:$0xf0]  ;;  %v786_v8 = vor.u32 %v952_v1, %v785_v0 }
  0x13   :  { %495 = vmatpush.bf16.msra.mxu1 %v986_v9  ;;  %1003 = vmatpush.bf16.msra.mxu3 %v986_v9  ;;  %v967_v6 = vld [vmem:[%s1402_s0 + $0xc4] sm:$0xf]  ;;  %v851_v7 = vld [vmem:[%s1402_s0 + $0xc8] sm:$0xf0]  ;;  %v850_v9 = vor.u32 %v968_v3, %v849_v2  ;;  %v953_v16 = vld [vmem:[%s1402_s0 + $0x54] sm:$0xf] }
  0x14   :  { %v795_v17 = vld [vmem:[%s1402_s0 + $0x58] sm:$0xf0]  ;;  %v969_v18 = vld [vmem:[%s1402_s0 + $0xd4] sm:$0xf]  ;;  %v955_v28 = vld [vmem:[%s1402_s0 + $0x64] sm:$0xf] }
  0x15   :  { %v859_v19 = vld [vmem:[%s1402_s0 + $0xd8] sm:$0xf0]  ;;  %v798_v22 = vor.u32 %v953_v16, %v795_v17  ;;  %v803_v29 = vld [vmem:[%s1402_s0 + $0x68] sm:$0xf0]  ;;  %v971_v30 = vld [vmem:[%s1402_s0 + $0xe4] sm:$0xf] }
  0x16   :  { %407 = vmatpush.bf16.msra.mxu0 %v977_v10  ;;  %996 = vmatpush.bf16.msra.mxu2 %v977_v10  ;;  %v790_v10 = vor.u32 %v951_v4, %v787_v5  ;;  %v862_v23 = vor.u32 %v969_v18, %v859_v19  ;;  %v867_v31 = vld [vmem:[%s1402_s0 + $0xe8] sm:$0xf0]  ;;  %v806_v34 = vor.u32 %v955_v28, %v803_v29  ;;  %v957_v40 = vld [vmem:[%s1402_s0 + $0x74] sm:$0xf]  ;;  %v811_v41 = vld [vmem:[%s1402_s0 + $0x78] sm:$0xf0] }
  0x17   :  { %496 = vmatpush.bf16.msra.mxu1 %v985_v11  ;;  %1004 = vmatpush.bf16.msra.mxu3 %v985_v11  ;;  %v854_v11 = vor.u32 %v967_v6, %v851_v7  ;;  %v870_v35 = vor.u32 %v971_v30, %v867_v31  ;;  %v973_v42 = vld [vmem:[%s1402_s0 + $0xf4] sm:$0xf]  ;;  %v875_v43 = vld [vmem:[%s1402_s0 + $0xf8] sm:$0xf0]  ;;  %v814_v46 = vor.u32 %v957_v40, %v811_v41 }
  0x18   :  { %v878_v47 = vor.u32 %v973_v42, %v875_v43 }
  0x1a   :  { %408 = vmatpush.bf16.msra.mxu0 %v976_v12  ;;  %997 = vmatpush.bf16.msra.mxu2 %v976_v12  ;;  %v793_v12 = vld [vmem:[%s1402_s0 + $0x50] sm:$0xf] }
  0x1b   :  { %497 = vmatpush.bf16.msra.mxu1 %v984_v13  ;;  %1005 = vmatpush.bf16.msra.mxu3 %v984_v13  ;;  %v954_v13 = vld [vmem:[%s1402_s0 + $0x54] sm:$0xf0] }
  0x1c   :  { %v794_v20 = vor.u32 %v954_v13, %v793_v12 }
  0x1e   :  { %409 = vmatpush.bf16.msra.mxu0 %v975_v14  ;;  %998 = vmatpush.bf16.msra.mxu2 %v975_v14  ;;  %v857_v14 = vld [vmem:[%s1402_s0 + $0xd0] sm:$0xf] }
  0x1f   :  { %498 = vmatpush.bf16.msra.mxu1 %v983_v15  ;;  %1006 = vmatpush.bf16.msra.mxu3 %v983_v15  ;;  %v970_v15 = vld [vmem:[%s1402_s0 + $0xd4] sm:$0xf0] }
  0x20   :  { %v858_v21 = vor.u32 %v970_v15, %v857_v14 }
  0x21   :  { %410 = vmatmul.bf16.vlgmr.msra.gmra.mxu0 %v754_v24  ;;  %450 = vmatmul.bf16.vlgmr.msra.gmra.mxu2 %v818_v25  ;;  %v801_v24 = vld [vmem:[%s1402_s0 + $0x60] sm:$0xf]  ;;  %v956_v25 = vld [vmem:[%s1402_s0 + $0x64] sm:$0xf0] }
  0x22   :  { %499 = vmatmul.bf16.vlgmr.msra.gmra.mxu1 %v758_v26  ;;  %539 = vmatmul.bf16.vlgmr.msra.gmra.mxu3 %v822_v27  ;;  %v865_v26 = vld [vmem:[%s1402_s0 + $0xe0] sm:$0xf]  ;;  %v972_v27 = vld [vmem:[%s1402_s0 + $0xe4] sm:$0xf0]  ;;  %v802_v32 = vor.u32 %v956_v25, %v801_v24 }
  0x23   :  { %v866_v33 = vor.u32 %v972_v27, %v865_v26 }
  0x31   :  { %415 = vmatmul.bf16.gmra.mxu0 %v762_v36  ;;  %455 = vmatmul.bf16.gmra.mxu2 %v826_v37  ;;  %v809_v36 = vld [vmem:[%s1402_s0 + $0x70] sm:$0xf]  ;;  %v958_v37 = vld [vmem:[%s1402_s0 + $0x74] sm:$0xf0] }
  0x32   :  { %504 = vmatmul.bf16.gmra.mxu1 %v766_v38  ;;  %544 = vmatmul.bf16.gmra.mxu3 %v830_v39  ;;  %v873_v38 = vld [vmem:[%s1402_s0 + $0xf0] sm:$0xf]  ;;  %v974_v39 = vld [vmem:[%s1402_s0 + $0xf4] sm:$0xf0]  ;;  %v810_v44 = vor.u32 %v958_v37, %v809_v36 }
  0x33   :  { %v874_v45 = vor.u32 %v974_v39, %v873_v38 }
  0x41   :  { %420 = vmatmul.bf16.gmra.mxu0 %v770_v48  ;;  %460 = vmatmul.bf16.gmra.mxu2 %v834_v49  ;;  %v1271_v49 = vld [vmem:[%s1403_s2] ss:$0 sm:$0xff] }
  0x42   :  { %509 = vmatmul.bf16.gmra.mxu1 %v774_v50  ;;  %549 = vmatmul.bf16.gmra.mxu3 %v838_v51 }
  0x51   :  { %425 = vmatmul.bf16.gmra.mxu0 %v778_v60  ;;  %465 = vmatmul.bf16.gmra.mxu2 %v842_v61 }
  0x52   :  { %514 = vmatmul.bf16.gmra.mxu1 %v782_v62  ;;  %554 = vmatmul.bf16.gmra.mxu3 %v846_v63 }
  0x61   :  { %430 = vmatmul.bf16.gmra.mxu0 %v786_v8  ;;  %470 = vmatmul.bf16.gmra.mxu2 %v850_v9 }
  0x62   :  { %519 = vmatmul.bf16.gmra.mxu1 %v790_v10  ;;  %559 = vmatmul.bf16.gmra.mxu3 %v854_v11 }
  0x71   :  { %435 = vmatmul.bf16.gmra.mxu0 %v794_v20  ;;  %475 = vmatmul.bf16.gmra.mxu2 %v858_v21 }
  0x72   :  { %524 = vmatmul.bf16.gmra.mxu1 %v798_v22  ;;  %564 = vmatmul.bf16.gmra.mxu3 %v862_v23 }
  0x81   :  { %440 = vmatmul.bf16.gmra.mxu0 %v802_v32  ;;  %480 = vmatmul.bf16.gmra.mxu2 %v866_v33 }
  0x82   :  { %529 = vmatmul.bf16.gmra.mxu1 %v806_v34  ;;  %569 = vmatmul.bf16.gmra.mxu3 %v870_v35 }
  0x91   :  { %445 = vmatmul.bf16.gmra.mxu0 %v810_v44  ;;  %485 = vmatmul.bf16.gmra.mxu2 %v874_v45 }
  0x92   :  { %534 = vmatmul.bf16.gmra.mxu1 %v814_v46  ;;  %574 = vmatmul.bf16.gmra.mxu3 %v878_v47 }
  0x9e   :  { %v411_v48 = vpop.f32.mrf.mxu0 }
  0x9f   :  { %v500_v50 = vpop.f32.mrf.mxu1 }
  0xa0   :  { %v501_v51 = vadd.f32 %v500_v50, %v411_v48 }
  0xa2   :  { %v683_v52 = vadd.f32 %v1271_v49, %v501_v51 }
  0xa4   :  { %715 = vst [vmem:[%s1404_s3] sm:$0xff] %v683_v52  ;;  %v451_v53 = vpop.f32.mrf.mxu2 }
  0xa5   :  { %v540_v54 = vpop.f32.mrf.mxu3 }
  0xa6   :  { %v541_v55 = vadd.f32 %v540_v54, %v451_v53  ;;  %v413_v56 = vpop.f32.mrf.mxu0 }
  0xa7   :  { %v502_v57 = vpop.f32.mrf.mxu1 }
  0xa8   :  { %v699_v58 = vadd.f32 %v1271_v49, %v541_v55  ;;  %v503_v59 = vadd.f32 %v502_v57, %v413_v56 }
  0xaa   :  { %731 = vst [vmem:[%s1404_s3 + $0x80] sm:$0xff] %v699_v58  ;;  %v684_v60 = vadd.f32 %v1271_v49, %v503_v59 }
  0xac   :  { %716 = vst [vmem:[%s1404_s3 + $0x8] sm:$0xff] %v684_v60  ;;  %v453_v61 = vpop.f32.mrf.mxu2 }
  0xad   :  { %v542_v62 = vpop.f32.mrf.mxu3 }
  0xae   :  { %v543_v63 = vadd.f32 %v542_v62, %v453_v61  ;;  %v416_v0 = vpop.f32.mrf.mxu0 }
  0xaf   :  { %v505_v1 = vpop.f32.mrf.mxu1 }
  0xb0   :  { %v700_v2 = vadd.f32 %v1271_v49, %v543_v63  ;;  %v506_v3 = vadd.f32 %v505_v1, %v416_v0 }
  0xb2   :  { %732 = vst [vmem:[%s1404_s3 + $0x88] sm:$0xff] %v700_v2  ;;  %v685_v4 = vadd.f32 %v1271_v49, %v506_v3 }
  0xb4   :  { %717 = vst [vmem:[%s1404_s3 + $0x10] sm:$0xff] %v685_v4  ;;  %v456_v5 = vpop.f32.mrf.mxu2 }
  0xb5   :  { %v545_v6 = vpop.f32.mrf.mxu3 }
  0xb6   :  { %v546_v7 = vadd.f32 %v545_v6, %v456_v5  ;;  %v418_v8 = vpop.f32.mrf.mxu0 }
  0xb7   :  { %v507_v9 = vpop.f32.mrf.mxu1 }
  0xb8   :  { %v701_v10 = vadd.f32 %v1271_v49, %v546_v7  ;;  %v508_v11 = vadd.f32 %v507_v9, %v418_v8 }
  0xba   :  { %733 = vst [vmem:[%s1404_s3 + $0x90] sm:$0xff] %v701_v10  ;;  %v686_v12 = vadd.f32 %v1271_v49, %v508_v11 }
  0xbc   :  { %718 = vst [vmem:[%s1404_s3 + $0x18] sm:$0xff] %v686_v12  ;;  %v458_v13 = vpop.f32.mrf.mxu2 }
  0xbd   :  { %v547_v14 = vpop.f32.mrf.mxu3 }
  0xbe   :  { %v548_v15 = vadd.f32 %v547_v14, %v458_v13  ;;  %v421_v16 = vpop.f32.mrf.mxu0 }
  0xbf   :  { %v510_v17 = vpop.f32.mrf.mxu1 }
  0xc0   :  { %v702_v18 = vadd.f32 %v1271_v49, %v548_v15  ;;  %v511_v19 = vadd.f32 %v510_v17, %v421_v16 }
  0xc2   :  { %734 = vst [vmem:[%s1404_s3 + $0x98] sm:$0xff] %v702_v18  ;;  %v687_v20 = vadd.f32 %v1271_v49, %v511_v19 }
  0xc4   :  { %719 = vst [vmem:[%s1404_s3 + $0x20] sm:$0xff] %v687_v20  ;;  %v461_v21 = vpop.f32.mrf.mxu2 }
  0xc5   :  { %v550_v22 = vpop.f32.mrf.mxu3 }
  0xc6   :  { %v551_v23 = vadd.f32 %v550_v22, %v461_v21  ;;  %v423_v24 = vpop.f32.mrf.mxu0 }
  0xc7   :  { %v512_v25 = vpop.f32.mrf.mxu1 }
  0xc8   :  { %v703_v26 = vadd.f32 %v1271_v49, %v551_v23  ;;  %v513_v27 = vadd.f32 %v512_v25, %v423_v24 }
  0xca   :  { %735 = vst [vmem:[%s1404_s3 + $0xa0] sm:$0xff] %v703_v26  ;;  %v688_v28 = vadd.f32 %v1271_v49, %v513_v27 }
  0xcc   :  { %720 = vst [vmem:[%s1404_s3 + $0x28] sm:$0xff] %v688_v28  ;;  %v463_v29 = vpop.f32.mrf.mxu2 }
  0xcd   :  { %v552_v30 = vpop.f32.mrf.mxu3 }
  0xce   :  { %v553_v31 = vadd.f32 %v552_v30, %v463_v29  ;;  %v426_v32 = vpop.f32.mrf.mxu0 }
  0xcf   :  { %v515_v33 = vpop.f32.mrf.mxu1 }
  0xd0   :  { %v704_v34 = vadd.f32 %v1271_v49, %v553_v31  ;;  %v516_v35 = vadd.f32 %v515_v33, %v426_v32 }
  0xd2   :  { %736 = vst [vmem:[%s1404_s3 + $0xa8] sm:$0xff] %v704_v34  ;;  %v689_v36 = vadd.f32 %v1271_v49, %v516_v35 }
  0xd4   :  { %721 = vst [vmem:[%s1404_s3 + $0x30] sm:$0xff] %v689_v36  ;;  %v466_v37 = vpop.f32.mrf.mxu2 }
  0xd5   :  { %v555_v38 = vpop.f32.mrf.mxu3 }
  0xd6   :  { %v556_v39 = vadd.f32 %v555_v38, %v466_v37  ;;  %v428_v40 = vpop.f32.mrf.mxu0 }
  0xd7   :  { %v517_v41 = vpop.f32.mrf.mxu1 }
  0xd8   :  { %v705_v42 = vadd.f32 %v1271_v49, %v556_v39  ;;  %v518_v43 = vadd.f32 %v517_v41, %v428_v40 }
  0xda   :  { %737 = vst [vmem:[%s1404_s3 + $0xb0] sm:$0xff] %v705_v42  ;;  %v690_v44 = vadd.f32 %v1271_v49, %v518_v43 }
  0xdc   :  { %722 = vst [vmem:[%s1404_s3 + $0x38] sm:$0xff] %v690_v44  ;;  %v468_v45 = vpop.f32.mrf.mxu2 }
  0xdd   :  { %v557_v46 = vpop.f32.mrf.mxu3 }
  0xde   :  { %v558_v47 = vadd.f32 %v557_v46, %v468_v45  ;;  %v431_v48 = vpop.f32.mrf.mxu0 }
  0xdf   :  { %v520_v50 = vpop.f32.mrf.mxu1 }
  0xe0   :  { %v706_v51 = vadd.f32 %v1271_v49, %v558_v47  ;;  %v521_v52 = vadd.f32 %v520_v50, %v431_v48 }
  0xe2   :  { %738 = vst [vmem:[%s1404_s3 + $0xb8] sm:$0xff] %v706_v51  ;;  %v691_v53 = vadd.f32 %v1271_v49, %v521_v52 }
  0xe4   :  { %723 = vst [vmem:[%s1404_s3 + $0x40] sm:$0xff] %v691_v53  ;;  %v471_v54 = vpop.f32.mrf.mxu2 }
  0xe5   :  { %v560_v55 = vpop.f32.mrf.mxu3 }
  0xe6   :  { %v561_v56 = vadd.f32 %v560_v55, %v471_v54  ;;  %v433_v57 = vpop.f32.mrf.mxu0 }
  0xe7   :  { %v522_v58 = vpop.f32.mrf.mxu1 }
  0xe8   :  { %v707_v59 = vadd.f32 %v1271_v49, %v561_v56  ;;  %v523_v60 = vadd.f32 %v522_v58, %v433_v57 }
  0xea   :  { %739 = vst [vmem:[%s1404_s3 + $0xc0] sm:$0xff] %v707_v59  ;;  %v692_v61 = vadd.f32 %v1271_v49, %v523_v60 }
  0xec   :  { %724 = vst [vmem:[%s1404_s3 + $0x48] sm:$0xff] %v692_v61  ;;  %v473_v62 = vpop.f32.mrf.mxu2 }
  0xed   :  { %v562_v63 = vpop.f32.mrf.mxu3 }
  0xee   :  { %v563_v0 = vadd.f32 %v562_v63, %v473_v62  ;;  %v436_v1 = vpop.f32.mrf.mxu0 }
  0xef   :  { %v525_v2 = vpop.f32.mrf.mxu1 }
  0xf0   :  { %v708_v3 = vadd.f32 %v1271_v49, %v563_v0  ;;  %v526_v4 = vadd.f32 %v525_v2, %v436_v1 }
  0xf2   :  { %740 = vst [vmem:[%s1404_s3 + $0xc8] sm:$0xff] %v708_v3  ;;  %v693_v5 = vadd.f32 %v1271_v49, %v526_v4 }
  0xf4   :  { %725 = vst [vmem:[%s1404_s3 + $0x50] sm:$0xff] %v693_v5  ;;  %v476_v6 = vpop.f32.mrf.mxu2 }
  0xf5   :  { %v565_v7 = vpop.f32.mrf.mxu3 }
  0xf6   :  { %v566_v8 = vadd.f32 %v565_v7, %v476_v6  ;;  %v438_v9 = vpop.f32.mrf.mxu0 }
  0xf7   :  { %v527_v10 = vpop.f32.mrf.mxu1 }
  0xf8   :  { %v709_v11 = vadd.f32 %v1271_v49, %v566_v8  ;;  %v528_v12 = vadd.f32 %v527_v10, %v438_v9 }
  0xfa   :  { %741 = vst [vmem:[%s1404_s3 + $0xd0] sm:$0xff] %v709_v11  ;;  %v694_v13 = vadd.f32 %v1271_v49, %v528_v12 }
  0xfc   :  { %726 = vst [vmem:[%s1404_s3 + $0x58] sm:$0xff] %v694_v13  ;;  %v478_v14 = vpop.f32.mrf.mxu2 }
  0xfd   :  { %v567_v15 = vpop.f32.mrf.mxu3 }
  0xfe   :  { %v568_v16 = vadd.f32 %v567_v15, %v478_v14  ;;  %v441_v17 = vpop.f32.mrf.mxu0 }
  0xff   :  { %v530_v18 = vpop.f32.mrf.mxu1 }
 0x100   :  { %v710_v19 = vadd.f32 %v1271_v49, %v568_v16  ;;  %v531_v20 = vadd.f32 %v530_v18, %v441_v17 }
 0x102   :  { %742 = vst [vmem:[%s1404_s3 + $0xd8] sm:$0xff] %v710_v19  ;;  %v695_v21 = vadd.f32 %v1271_v49, %v531_v20 }
 0x104   :  { %727 = vst [vmem:[%s1404_s3 + $0x60] sm:$0xff] %v695_v21  ;;  %v481_v22 = vpop.f32.mrf.mxu2 }
 0x105   :  { %v570_v23 = vpop.f32.mrf.mxu3 }
 0x106   :  { %v571_v24 = vadd.f32 %v570_v23, %v481_v22  ;;  %v443_v25 = vpop.f32.mrf.mxu0 }
 0x107   :  { %v532_v26 = vpop.f32.mrf.mxu1 }
 0x108   :  { %v711_v27 = vadd.f32 %v1271_v49, %v571_v24  ;;  %v533_v28 = vadd.f32 %v532_v26, %v443_v25 }
 0x10a   :  { %743 = vst [vmem:[%s1404_s3 + $0xe0] sm:$0xff] %v711_v27  ;;  %v696_v29 = vadd.f32 %v1271_v49, %v533_v28 }
 0x10c   :  { %728 = vst [vmem:[%s1404_s3 + $0x68] sm:$0xff] %v696_v29  ;;  %v483_v30 = vpop.f32.mrf.mxu2 }
 0x10d   :  { %v572_v31 = vpop.f32.mrf.mxu3 }
 0x10e   :  { %v573_v32 = vadd.f32 %v572_v31, %v483_v30  ;;  %v446_v33 = vpop.f32.mrf.mxu0 }
 0x10f   :  { %v535_v34 = vpop.f32.mrf.mxu1 }
 0x110   :  { %v712_v35 = vadd.f32 %v1271_v49, %v573_v32  ;;  %v536_v36 = vadd.f32 %v535_v34, %v446_v33 }
 0x112   :  { %744 = vst [vmem:[%s1404_s3 + $0xe8] sm:$0xff] %v712_v35  ;;  %v697_v37 = vadd.f32 %v1271_v49, %v536_v36 }
 0x114   :  { %729 = vst [vmem:[%s1404_s3 + $0x70] sm:$0xff] %v697_v37  ;;  %v486_v38 = vpop.f32.mrf.mxu2 }
 0x115   :  { %v575_v39 = vpop.f32.mrf.mxu3 }
 0x116   :  { %v576_v40 = vadd.f32 %v575_v39, %v486_v38  ;;  %v448_v41 = vpop.f32.mrf.mxu0 }
 0x117   :  { %v537_v42 = vpop.f32.mrf.mxu1 }
 0x118   :  { %v713_v43 = vadd.f32 %v1271_v49, %v576_v40  ;;  %v538_v44 = vadd.f32 %v537_v42, %v448_v41 }
 0x11a   :  { %745 = vst [vmem:[%s1404_s3 + $0xf0] sm:$0xff] %v713_v43  ;;  %v698_v45 = vadd.f32 %v1271_v49, %v538_v44 }
 0x11c   :  { %730 = vst [vmem:[%s1404_s3 + $0x78] sm:$0xff] %v698_v45  ;;  %v488_v46 = vpop.f32.mrf.mxu2 }
 0x11d   :  { %v577_v47 = vpop.f32.mrf.mxu3 }
 0x11e   :  { %v578_v48 = vadd.f32 %v577_v47, %v488_v46 }
 0x120   :  { %v714_v50 = vadd.f32 %v1271_v49, %v578_v48 }
 0x122   :  { %746 = vst [vmem:[%s1404_s3 + $0xf8] sm:$0xff] %v714_v50 }

// kernel: gcn_forward.13
= control target key start
LH: loop header
LB: loop body
LE: loop exit
PB: predicated region body
PF: predicated region fallthrough
CT: control target
= control target key end

     0   :  { %v14_v0 = vlaneseq  ;;  %v708_v12 = vmov 1.0   ;;  %s1005_s1 = inlined_call_operand.vmem [shape: s32[1,128], index: 1, kind: input, shape index: {}]   ;;  %s1006_s0 = inlined_call_operand.vmem [shape: s32[1,128], index: 0, kind: input, shape index: {}]   ;;  %s1007_s2 = inlined_call_operand.vmem [shape: f32[128,256], index: 2, kind: input, shape index: {}]   ;;  %s1008_s3 = inlined_call_operand.vmem [shape: f32[1,128], index: 3, kind: output, shape index: {}]  }
   0x1   :  { %v734_v2 = vld [vmem:[%s1005_s1] ss:$0 sm:$0xff]  ;;  %v244_v37 = vld [vmem:[%s1007_s2 + $0x8] sm:$0xff]  ;;  %v245_v38 = vld [vmem:[%s1007_s2 + $0x10] sm:$0xff] }
   0x2   :  { %v729_v1 = vshrl.u32 %v14_v0, 7  ;;  %v739_v3 = vld [vmem:[%s1006_s0] ss:$0 sm:$0xff]  ;;  %v246_v39 = vld [vmem:[%s1007_s2 + $0x18] sm:$0xff]  ;;  %v248_v41 = vld [vmem:[%s1007_s2 + $0x28] sm:$0xff] }
   0x3   :  { %v243_v36 = vld [vmem:[%s1007_s2] sm:$0xff]  ;;  %v249_v42 = vld [vmem:[%s1007_s2 + $0x30] sm:$0xff]  ;;  %v250_v43 = vld [vmem:[%s1007_s2 + $0x38] sm:$0xff] }
   0x4   :  { %v30_v4 = vadd.s32 120, %v729_v1  ;;  %v46_v5 = vadd.s32 248, %v729_v1  ;;  %v29_v6 = vadd.s32 112, %v729_v1  ;;  %v45_v7 = vadd.s32 240, %v729_v1  ;;  %v247_v40 = vld [vmem:[%s1007_s2 + $0x20] sm:$0xff]  ;;  %v252_v45 = vld [vmem:[%s1007_s2 + $0x48] sm:$0xff] }
   0x5   :  { %v28_v8 = vadd.s32 104, %v729_v1  ;;  %v44_v9 = vadd.s32 232, %v729_v1  ;;  %v27_v10 = vadd.s32 96, %v729_v1  ;;  %v43_v11 = vadd.s32 224, %v729_v1  ;;  %v251_v44 = vld [vmem:[%s1007_s2 + $0x40] sm:$0xff]  ;;  %v253_v46 = vld [vmem:[%s1007_s2 + $0x50] sm:$0xff] }
   0x6   :  { %vm162_vm0 = vcmp.eq.s32.totalorder %v30_v4, %v734_v2  ;;  %vm178_vm1 = vcmp.eq.s32.totalorder %v46_v5, %v734_v2  ;;  %vm161_vm2 = vcmp.eq.s32.totalorder %v29_v6, %v734_v2  ;;  %vm177_vm3 = vcmp.eq.s32.totalorder %v45_v7, %v734_v2  ;;  %v254_v47 = vld [vmem:[%s1007_s2 + $0x58] sm:$0xff]  ;;  %v255_v48 = vld [vmem:[%s1007_s2 + $0x60] sm:$0xff]  ;;  %v256_v49 = vld [vmem:[%s1007_s2 + $0x68] sm:$0xff] }
   0x7   :  { %673 = vmatpush.msk.msra.mxu2 %vm162_vm0, %v708_v12  ;;  %689 = vmatpush.msk.msra.mxu3 %vm178_vm1, %v708_v12  ;;  %vm160_vm4 = vcmp.eq.s32.totalorder %v28_v8, %v734_v2  ;;  %vm64_vm5 = vcmp.eq.s32.totalorder %v30_v4, %v739_v3  ;;  %vm176_vm6 = vcmp.eq.s32.totalorder %v44_v9, %v734_v2  ;;  %v26_v13 = vadd.s32 88, %v729_v1  ;;  %v257_v50 = vld [vmem:[%s1007_s2 + $0x70] sm:$0xff]  ;;  %v258_v51 = vld [vmem:[%s1007_s2 + $0x78] sm:$0xff]  ;;  %v259_v52 = vld [vmem:[%s1007_s2 + $0x80] sm:$0xff] }
   0x8   :  { %641 = vmatpush.msk.msra.mxu0 %vm64_vm5, %v708_v12  ;;  %vm80_vm7 = vcmp.eq.s32.totalorder %v46_v5, %v739_v3  ;;  %vm63_vm8 = vcmp.eq.s32.totalorder %v29_v6, %v739_v3  ;;  %vm79_vm9 = vcmp.eq.s32.totalorder %v45_v7, %v739_v3  ;;  %v42_v14 = vadd.s32 216, %v729_v1  ;;  %v260_v53 = vld [vmem:[%s1007_s2 + $0x88] sm:$0xff]  ;;  %v261_v54 = vld [vmem:[%s1007_s2 + $0x90] sm:$0xff]  ;;  %v262_v55 = vld [vmem:[%s1007_s2 + $0x98] sm:$0xff] }
   0x9   :  { %674 = vmatpush.msk.msra.mxu2 %vm161_vm2, %v708_v12  ;;  %690 = vmatpush.msk.msra.mxu3 %vm177_vm3, %v708_v12  ;;  %vm62_vm10 = vcmp.eq.s32.totalorder %v28_v8, %v739_v3  ;;  %vm159_vm11 = vcmp.eq.s32.totalorder %v27_v10, %v734_v2  ;;  %vm175_vm12 = vcmp.eq.s32.totalorder %v43_v11, %v734_v2  ;;  %v25_v15 = vadd.s32 80, %v729_v1  ;;  %v263_v56 = vld [vmem:[%s1007_s2 + $0xa0] sm:$0xff]  ;;  %v264_v57 = vld [vmem:[%s1007_s2 + $0xa8] sm:$0xff]  ;;  %v265_v58 = vld [vmem:[%s1007_s2 + $0xb0] sm:$0xff] }
   0xa   :  { %657 = vmatpush.msk.msra.mxu1 %vm80_vm7, %v708_v12  ;;  %642 = vmatpush.msk.msra.mxu0 %vm63_vm8, %v708_v12  ;;  %v41_v16 = vadd.s32 208, %v729_v1  ;;  %vm78_vm13 = vcmp.eq.s32.totalorder %v44_v9, %v739_v3  ;;  %vm61_vm14 = vcmp.eq.s32.totalorder %v27_v10, %v739_v3  ;;  %vm158_vm15 = vcmp.eq.s32.totalorder %v26_v13, %v734_v2  ;;  %v266_v59 = vld [vmem:[%s1007_s2 + $0xb8] sm:$0xff]  ;;  %v267_v60 = vld [vmem:[%s1007_s2 + $0xc0] sm:$0xff]  ;;  %v268_v61 = vld [vmem:[%s1007_s2 + $0xc8] sm:$0xff] }
   0xb   :  { %675 = vmatpush.msk.msra.mxu2 %vm160_vm4, %v708_v12  ;;  %691 = vmatpush.msk.msra.mxu3 %vm176_vm6, %v708_v12  ;;  %vm174_vm0 = vcmp.eq.s32.totalorder %v42_v14, %v734_v2  ;;  %v24_v17 = vadd.s32 72, %v729_v1  ;;  %v40_v18 = vadd.s32 200, %v729_v1  ;;  %vm77_vm1 = vcmp.eq.s32.totalorder %v43_v11, %v739_v3  ;;  %v269_v62 = vld [vmem:[%s1007_s2 + $0xd0] sm:$0xff]  ;;  %v270_v63 = vld [vmem:[%s1007_s2 + $0xd8] sm:$0xff]  ;;  %v271_v0 = vld [vmem:[%s1007_s2 + $0xe0] sm:$0xff] }
   0xc   :  { %658 = vmatpush.msk.msra.mxu1 %vm79_vm9, %v708_v12  ;;  %643 = vmatpush.msk.msra.mxu0 %vm62_vm10, %v708_v12  ;;  %vm60_vm2 = vcmp.eq.s32.totalorder %v26_v13, %v739_v3  ;;  %vm157_vm3 = vcmp.eq.s32.totalorder %v25_v15, %v734_v2  ;;  %vm173_vm4 = vcmp.eq.s32.totalorder %v41_v16, %v734_v2  ;;  %v23_v19 = vadd.s32 64, %v729_v1 }
   0xd   :  { %676 = vmatpush.msk.msra.mxu2 %vm159_vm11, %v708_v12  ;;  %692 = vmatpush.msk.msra.mxu3 %vm175_vm12, %v708_v12  ;;  %v39_v20 = vadd.s32 192, %v729_v1  ;;  %vm76_vm5 = vcmp.eq.s32.totalorder %v42_v14, %v739_v3  ;;  %vm59_vm6 = vcmp.eq.s32.totalorder %v25_v15, %v739_v3  ;;  %vm156_vm7 = vcmp.eq.s32.totalorder %v24_v17, %v734_v2 }
   0xe   :  { %659 = vmatpush.msk.msra.mxu1 %vm78_vm13, %v708_v12  ;;  %644 = vmatpush.msk.msra.mxu0 %vm61_vm14, %v708_v12  ;;  %vm172_vm8 = vcmp.eq.s32.totalorder %v40_v18, %v734_v2  ;;  %v22_v21 = vadd.s32 56, %v729_v1  ;;  %v38_v22 = vadd.s32 184, %v729_v1  ;;  %vm75_vm9 = vcmp.eq.s32.totalorder %v41_v16, %v739_v3 }
   0xf   :  { %677 = vmatpush.msk.msra.mxu2 %vm158_vm15, %v708_v12  ;;  %693 = vmatpush.msk.msra.mxu3 %vm174_vm0, %v708_v12  ;;  %vm58_vm10 = vcmp.eq.s32.totalorder %v24_v17, %v739_v3  ;;  %vm155_vm11 = vcmp.eq.s32.totalorder %v23_v19, %v734_v2  ;;  %vm171_vm12 = vcmp.eq.s32.totalorder %v39_v20, %v734_v2  ;;  %v21_v23 = vadd.s32 48, %v729_v1 }
  0x10   :  { %660 = vmatpush.msk.msra.mxu1 %vm77_vm1, %v708_v12  ;;  %645 = vmatpush.msk.msra.mxu0 %vm60_vm2, %v708_v12  ;;  %v37_v24 = vadd.s32 176, %v729_v1  ;;  %vm74_vm13 = vcmp.eq.s32.totalorder %v40_v18, %v739_v3  ;;  %vm57_vm14 = vcmp.eq.s32.totalorder %v23_v19, %v739_v3  ;;  %vm154_vm15 = vcmp.eq.s32.totalorder %v22_v21, %v734_v2 }
  0x11   :  { %678 = vmatpush.msk.msra.mxu2 %vm157_vm3, %v708_v12  ;;  %694 = vmatpush.msk.msra.mxu3 %vm173_vm4, %v708_v12  ;;  %vm170_vm0 = vcmp.eq.s32.totalorder %v38_v22, %v734_v2  ;;  %v20_v25 = vadd.s32 40, %v729_v1  ;;  %v36_v26 = vadd.s32 168, %v729_v1  ;;  %vm73_vm1 = vcmp.eq.s32.totalorder %v39_v20, %v739_v3 }
  0x12   :  { %661 = vmatpush.msk.msra.mxu1 %vm76_vm5, %v708_v12  ;;  %646 = vmatpush.msk.msra.mxu0 %vm59_vm6, %v708_v12  ;;  %vm56_vm2 = vcmp.eq.s32.totalorder %v22_v21, %v739_v3  ;;  %vm153_vm3 = vcmp.eq.s32.totalorder %v21_v23, %v734_v2  ;;  %vm169_vm4 = vcmp.eq.s32.totalorder %v37_v24, %v734_v2  ;;  %v19_v27 = vadd.s32 32, %v729_v1 }
  0x13   :  { %679 = vmatpush.msk.msra.mxu2 %vm156_vm7, %v708_v12  ;;  %695 = vmatpush.msk.msra.mxu3 %vm172_vm8, %v708_v12  ;;  %v35_v28 = vadd.s32 160, %v729_v1  ;;  %vm72_vm5 = vcmp.eq.s32.totalorder %v38_v22, %v739_v3  ;;  %vm55_vm6 = vcmp.eq.s32.totalorder %v21_v23, %v739_v3  ;;  %vm152_vm7 = vcmp.eq.s32.totalorder %v20_v25, %v734_v2 }
  0x14   :  { %662 = vmatpush.msk.msra.mxu1 %vm75_vm9, %v708_v12  ;;  %647 = vmatpush.msk.msra.mxu0 %vm58_vm10, %v708_v12  ;;  %vm168_vm8 = vcmp.eq.s32.totalorder %v36_v26, %v734_v2  ;;  %v18_v29 = vadd.s32 24, %v729_v1  ;;  %v34_v30 = vadd.s32 152, %v729_v1  ;;  %vm71_vm9 = vcmp.eq.s32.totalorder %v37_v24, %v739_v3 }
  0x15   :  { %680 = vmatpush.msk.msra.mxu2 %vm155_vm11, %v708_v12  ;;  %696 = vmatpush.msk.msra.mxu3 %vm171_vm12, %v708_v12  ;;  %vm54_vm10 = vcmp.eq.s32.totalorder %v20_v25, %v739_v3  ;;  %vm151_vm11 = vcmp.eq.s32.totalorder %v19_v27, %v734_v2  ;;  %vm167_vm12 = vcmp.eq.s32.totalorder %v35_v28, %v734_v2  ;;  %v17_v31 = vadd.s32 16, %v729_v1 }
  0x16   :  { %663 = vmatpush.msk.msra.mxu1 %vm74_vm13, %v708_v12  ;;  %648 = vmatpush.msk.msra.mxu0 %vm57_vm14, %v708_v12  ;;  %v33_v32 = vadd.s32 144, %v729_v1  ;;  %vm70_vm13 = vcmp.eq.s32.totalorder %v36_v26, %v739_v3  ;;  %vm53_vm14 = vcmp.eq.s32.totalorder %v19_v27, %v739_v3  ;;  %v16_v33 = vadd.s32 8, %v729_v1 }
  0x17   :  { %681 = vmatpush.msk.msra.mxu2 %vm154_vm15, %v708_v12  ;;  %697 = vmatpush.msk.msra.mxu3 %vm170_vm0, %v708_v12  ;;  %vm150_vm15 = vcmp.eq.s32.totalorder %v18_v29, %v734_v2  ;;  %vm166_vm0 = vcmp.eq.s32.totalorder %v34_v30, %v734_v2  ;;  %v32_v34 = vadd.s32 136, %v729_v1  ;;  %v31_v35 = vadd.s32 128, %v729_v1 }
  0x18   :  { %664 = vmatpush.msk.msra.mxu1 %vm73_vm1, %v708_v12  ;;  %649 = vmatpush.msk.msra.mxu0 %vm56_vm2, %v708_v12  ;;  %vm69_vm1 = vcmp.eq.s32.totalorder %v35_v28, %v739_v3  ;;  %vm52_vm2 = vcmp.eq.s32.totalorder %v18_v29, %v739_v3 }
  0x19   :  { %682 = vmatpush.msk.msra.mxu2 %vm153_vm3, %v708_v12  ;;  %698 = vmatpush.msk.msra.mxu3 %vm169_vm4, %v708_v12  ;;  %vm149_vm3 = vcmp.eq.s32.totalorder %v17_v31, %v734_v2  ;;  %vm165_vm4 = vcmp.eq.s32.totalorder %v33_v32, %v734_v2 }
  0x1a   :  { %665 = vmatpush.msk.msra.mxu1 %vm72_vm5, %v708_v12  ;;  %650 = vmatpush.msk.msra.mxu0 %vm55_vm6, %v708_v12  ;;  %vm68_vm5 = vcmp.eq.s32.totalorder %v34_v30, %v739_v3  ;;  %vm51_vm6 = vcmp.eq.s32.totalorder %v17_v31, %v739_v3 }
  0x1b   :  { %683 = vmatpush.msk.msra.mxu2 %vm152_vm7, %v708_v12  ;;  %699 = vmatpush.msk.msra.mxu3 %vm168_vm8, %v708_v12  ;;  %vm148_vm7 = vcmp.eq.s32.totalorder %v16_v33, %v734_v2  ;;  %vm164_vm8 = vcmp.eq.s32.totalorder %v32_v34, %v734_v2 }
  0x1c   :  { %666 = vmatpush.msk.msra.mxu1 %vm71_vm9, %v708_v12  ;;  %651 = vmatpush.msk.msra.mxu0 %vm54_vm10, %v708_v12  ;;  %vm67_vm9 = vcmp.eq.s32.totalorder %v33_v32, %v739_v3  ;;  %vm50_vm10 = vcmp.eq.s32.totalorder %v16_v33, %v739_v3 }
  0x1d   :  { %684 = vmatpush.msk.msra.mxu2 %vm151_vm11, %v708_v12  ;;  %700 = vmatpush.msk.msra.mxu3 %vm167_vm12, %v708_v12  ;;  %vm147_vm11 = vcmp.eq.s32.totalorder %v729_v1, %v734_v2  ;;  %vm163_vm12 = vcmp.eq.s32.totalorder %v31_v35, %v734_v2  ;;  %v273_v2 = vld [vmem:[%s1007_s2 + $0xf0] sm:$0xff] }
  0x1e   :  { %667 = vmatpush.msk.msra.mxu1 %vm70_vm13, %v708_v12  ;;  %652 = vmatpush.msk.msra.mxu0 %vm53_vm14, %v708_v12  ;;  %vm66_vm13 = vcmp.eq.s32.totalorder %v32_v34, %v739_v3  ;;  %vm49_vm14 = vcmp.eq.s32.totalorder %v729_v1, %v739_v3  ;;  %v272_v1 = vld [vmem:[%s1007_s2 + $0xe8] sm:$0xff] }
  0x1f   :  { %685 = vmatpush.msk.msra.mxu2 %vm150_vm15, %v708_v12  ;;  %701 = vmatpush.msk.msra.mxu3 %vm166_vm0, %v708_v12  ;;  %vm65_vm15 = vcmp.eq.s32.totalorder %v31_v35, %v739_v3  ;;  %v274_v3 = vld [vmem:[%s1007_s2 + $0xf8] sm:$0xff] }
  0x20   :  { %668 = vmatpush.msk.msra.mxu1 %vm69_vm1, %v708_v12  ;;  %653 = vmatpush.msk.msra.mxu0 %vm52_vm2, %v708_v12 }
  0x21   :  { %686 = vmatpush.msk.msra.mxu2 %vm149_vm3, %v708_v12  ;;  %702 = vmatpush.msk.msra.mxu3 %vm165_vm4, %v708_v12 }
  0x22   :  { %669 = vmatpush.msk.msra.mxu1 %vm68_vm5, %v708_v12  ;;  %654 = vmatpush.msk.msra.mxu0 %vm51_vm6, %v708_v12 }
  0x23   :  { %687 = vmatpush.msk.msra.mxu2 %vm148_vm7, %v708_v12  ;;  %703 = vmatpush.msk.msra.mxu3 %vm164_vm8, %v708_v12 }
  0x24   :  { %670 = vmatpush.msk.msra.mxu1 %vm67_vm9, %v708_v12  ;;  %655 = vmatpush.msk.msra.mxu0 %vm50_vm10, %v708_v12 }
  0x25   :  { %688 = vmatpush.msk.msra.mxu2 %vm147_vm11, %v708_v12  ;;  %704 = vmatpush.msk.msra.mxu3 %vm163_vm12, %v708_v12 }
  0x26   :  { %421 = vmatmul.f32.vlgmr.msra.gmra.mxu2 %v243_v36  ;;  %486 = vmatmul.f32.vlgmr.msra.gmra.mxu3 %v244_v37 }
  0x27   :  { %671 = vmatpush.msk.msra.mxu1 %vm66_vm13, %v708_v12  ;;  %656 = vmatpush.msk.msra.mxu0 %vm49_vm14, %v708_v12 }
  0x28   :  { %291 = vmatmul.f32.vlgmr.msra.gmra.mxu0 %v243_v36 }
  0x29   :  { %672 = vmatpush.msk.msra.mxu1 %vm65_vm15, %v708_v12 }
  0x2a   :  { %356 = vmatmul.f32.vlgmr.msra.gmra.mxu1 %v244_v37 }
  0x2e   :  { %424 = vmatmul.f32.gmra.mxu2 %v245_v38  ;;  %489 = vmatmul.f32.gmra.mxu3 %v246_v39 }
  0x30   :  { %294 = vmatmul.f32.gmra.mxu0 %v245_v38 }
  0x32   :  { %359 = vmatmul.f32.gmra.mxu1 %v246_v39 }
  0x36   :  { %427 = vmatmul.f32.gmra.mxu2 %v247_v40  ;;  %492 = vmatmul.f32.gmra.mxu3 %v248_v41 }
  0x38   :  { %297 = vmatmul.f32.gmra.mxu0 %v247_v40 }
  0x3a   :  { %362 = vmatmul.f32.gmra.mxu1 %v248_v41 }
  0x3e   :  { %430 = vmatmul.f32.gmra.mxu2 %v249_v42  ;;  %495 = vmatmul.f32.gmra.mxu3 %v250_v43 }
  0x40   :  { %300 = vmatmul.f32.gmra.mxu0 %v249_v42 }
  0x42   :  { %365 = vmatmul.f32.gmra.mxu1 %v250_v43 }
  0x46   :  { %433 = vmatmul.f32.gmra.mxu2 %v251_v44  ;;  %498 = vmatmul.f32.gmra.mxu3 %v252_v45 }
  0x48   :  { %303 = vmatmul.f32.gmra.mxu0 %v251_v44 }
  0x4a   :  { %368 = vmatmul.f32.gmra.mxu1 %v252_v45 }
  0x4e   :  { %436 = vmatmul.f32.gmra.mxu2 %v253_v46  ;;  %501 = vmatmul.f32.gmra.mxu3 %v254_v47 }
  0x50   :  { %306 = vmatmul.f32.gmra.mxu0 %v253_v46 }
  0x52   :  { %371 = vmatmul.f32.gmra.mxu1 %v254_v47 }
  0x56   :  { %439 = vmatmul.f32.gmra.mxu2 %v255_v48  ;;  %504 = vmatmul.f32.gmra.mxu3 %v256_v49 }
  0x58   :  { %309 = vmatmul.f32.gmra.mxu0 %v255_v48 }
  0x5a   :  { %374 = vmatmul.f32.gmra.mxu1 %v256_v49 }
  0x5e   :  { %442 = vmatmul.f32.gmra.mxu2 %v257_v50  ;;  %507 = vmatmul.f32.gmra.mxu3 %v258_v51 }
  0x60   :  { %312 = vmatmul.f32.gmra.mxu0 %v257_v50 }
  0x62   :  { %377 = vmatmul.f32.gmra.mxu1 %v258_v51 }
  0x66   :  { %445 = vmatmul.f32.gmra.mxu2 %v259_v52  ;;  %510 = vmatmul.f32.gmra.mxu3 %v260_v53 }
  0x68   :  { %315 = vmatmul.f32.gmra.mxu0 %v259_v52 }
  0x6a   :  { %380 = vmatmul.f32.gmra.mxu1 %v260_v53 }
  0x6e   :  { %448 = vmatmul.f32.gmra.mxu2 %v261_v54  ;;  %513 = vmatmul.f32.gmra.mxu3 %v262_v55 }
  0x70   :  { %318 = vmatmul.f32.gmra.mxu0 %v261_v54 }
  0x72   :  { %383 = vmatmul.f32.gmra.mxu1 %v262_v55 }
  0x76   :  { %451 = vmatmul.f32.gmra.mxu2 %v263_v56  ;;  %516 = vmatmul.f32.gmra.mxu3 %v264_v57 }
  0x78   :  { %321 = vmatmul.f32.gmra.mxu0 %v263_v56 }
  0x7a   :  { %386 = vmatmul.f32.gmra.mxu1 %v264_v57 }
  0x7e   :  { %454 = vmatmul.f32.gmra.mxu2 %v265_v58  ;;  %519 = vmatmul.f32.gmra.mxu3 %v266_v59 }
  0x80   :  { %324 = vmatmul.f32.gmra.mxu0 %v265_v58 }
  0x82   :  { %389 = vmatmul.f32.gmra.mxu1 %v266_v59 }
  0x86   :  { %457 = vmatmul.f32.gmra.mxu2 %v267_v60  ;;  %522 = vmatmul.f32.gmra.mxu3 %v268_v61 }
  0x88   :  { %327 = vmatmul.f32.gmra.mxu0 %v267_v60 }
  0x8a   :  { %392 = vmatmul.f32.gmra.mxu1 %v268_v61 }
  0x8e   :  { %460 = vmatmul.f32.gmra.mxu2 %v269_v62  ;;  %525 = vmatmul.f32.gmra.mxu3 %v270_v63 }
  0x90   :  { %330 = vmatmul.f32.gmra.mxu0 %v269_v62 }
  0x92   :  { %395 = vmatmul.f32.gmra.mxu1 %v270_v63 }
  0x96   :  { %463 = vmatmul.f32.gmra.mxu2 %v271_v0  ;;  %528 = vmatmul.f32.gmra.mxu3 %v272_v1 }
  0x98   :  { %333 = vmatmul.f32.gmra.mxu0 %v271_v0 }
  0x9a   :  { %398 = vmatmul.f32.gmra.mxu1 %v272_v1 }
  0x9e   :  { %466 = vmatmul.f32.gmra.mxu2 %v273_v2  ;;  %531 = vmatmul.f32.gmra.mxu3 %v274_v3 }
  0xa0   :  { %336 = vmatmul.f32.gmra.mxu0 %v273_v2 }
  0xa2   :  { %401 = vmatmul.f32.gmra.mxu1 %v274_v3 }
  0xa5   :  { %v292_v4 = vpop.f32.mrf.mxu0 }
  0xa7   :  { %v357_v5 = vpop.f32.mrf.mxu1 }
  0xa8   :  { %v358_v6 = vadd.f32 %v357_v5, %v292_v4 }
  0xa9   :  { %v422_v7 = vpop.f32.mrf.mxu2  ;;  %v487_v8 = vpop.f32.mrf.mxu3 }
  0xaa   :  { %v488_v9 = vadd.f32 %v487_v8, %v422_v7 }
  0xac   :  { %v535_v10 = vmul.f32 %v488_v9, %v358_v6 }
  0xad   :  { %v295_v11 = vpop.f32.mrf.mxu0 }
  0xaf   :  { %v360_v12 = vpop.f32.mrf.mxu1 }
  0xb0   :  { %v361_v13 = vadd.f32 %v360_v12, %v295_v11 }
  0xb1   :  { %v425_v14 = vpop.f32.mrf.mxu2  ;;  %v490_v15 = vpop.f32.mrf.mxu3 }
  0xb2   :  { %v491_v16 = vadd.f32 %v490_v15, %v425_v14 }
  0xb4   :  { %v536_v17 = vmul.f32 %v491_v16, %v361_v13 }
  0xb5   :  { %v298_v18 = vpop.f32.mrf.mxu0 }
  0xb6   :  { %v551_v19 = vadd.f32 %v536_v17, %v535_v10 }
  0xb7   :  { %v363_v20 = vpop.f32.mrf.mxu1 }
  0xb8   :  { %v364_v21 = vadd.f32 %v363_v20, %v298_v18 }
  0xb9   :  { %v428_v22 = vpop.f32.mrf.mxu2  ;;  %v493_v23 = vpop.f32.mrf.mxu3 }
  0xba   :  { %v494_v24 = vadd.f32 %v493_v23, %v428_v22 }
  0xbc   :  { %v537_v25 = vmul.f32 %v494_v24, %v364_v21 }
  0xbd   :  { %v301_v26 = vpop.f32.mrf.mxu0 }
  0xbe   :  { %v552_v27 = vadd.f32 %v551_v19, %v537_v25 }
  0xbf   :  { %v366_v28 = vpop.f32.mrf.mxu1 }
  0xc0   :  { %v367_v29 = vadd.f32 %v366_v28, %v301_v26 }
  0xc1   :  { %v431_v30 = vpop.f32.mrf.mxu2  ;;  %v496_v31 = vpop.f32.mrf.mxu3 }
  0xc2   :  { %v497_v32 = vadd.f32 %v496_v31, %v431_v30 }
  0xc4   :  { %v538_v33 = vmul.f32 %v497_v32, %v367_v29 }
  0xc5   :  { %v304_v34 = vpop.f32.mrf.mxu0 }
  0xc6   :  { %v553_v35 = vadd.f32 %v552_v27, %v538_v33 }
  0xc7   :  { %v369_v36 = vpop.f32.mrf.mxu1 }
  0xc8   :  { %v370_v37 = vadd.f32 %v369_v36, %v304_v34 }
  0xc9   :  { %v434_v38 = vpop.f32.mrf.mxu2  ;;  %v499_v39 = vpop.f32.mrf.mxu3 }
  0xca   :  { %v500_v40 = vadd.f32 %v499_v39, %v434_v38 }
  0xcc   :  { %v539_v41 = vmul.f32 %v500_v40, %v370_v37 }
  0xcd   :  { %v307_v42 = vpop.f32.mrf.mxu0 }
  0xce   :  { %v554_v43 = vadd.f32 %v553_v35, %v539_v41 }
  0xcf   :  { %v372_v44 = vpop.f32.mrf.mxu1 }
  0xd0   :  { %v373_v11 = vadd.f32 %v372_v44, %v307_v42 }
  0xd1   :  { %v437_v45 = vpop.f32.mrf.mxu2  ;;  %v502_v46 = vpop.f32.mrf.mxu3 }
  0xd2   :  { %v503_v12 = vadd.f32 %v502_v46, %v437_v45 }
  0xd4   :  { %v540_v16 = vmul.f32 %v503_v12, %v373_v11 }
  0xd5   :  { %v310_v47 = vpop.f32.mrf.mxu0 }
  0xd6   :  { %v555_v25 = vadd.f32 %v554_v43, %v540_v16 }
  0xd7   :  { %v375_v48 = vpop.f32.mrf.mxu1 }
  0xd8   :  { %v376_v13 = vadd.f32 %v375_v48, %v310_v47 }
  0xd9   :  { %v440_v49 = vpop.f32.mrf.mxu2  ;;  %v505_v50 = vpop.f32.mrf.mxu3 }
  0xda   :  { %v506_v14 = vadd.f32 %v505_v50, %v440_v49 }
  0xdc   :  { %v541_v20 = vmul.f32 %v506_v14, %v376_v13 }
  0xdd   :  { %v313_v51 = vpop.f32.mrf.mxu0 }
  0xde   :  { %v556_v29 = vadd.f32 %v555_v25, %v541_v20 }
  0xdf   :  { %v378_v52 = vpop.f32.mrf.mxu1 }
  0xe0   :  { %v379_v17 = vadd.f32 %v378_v52, %v313_v51 }
  0xe1   :  { %v443_v53 = vpop.f32.mrf.mxu2  ;;  %v508_v54 = vpop.f32.mrf.mxu3 }
  0xe2   :  { %v509_v18 = vadd.f32 %v508_v54, %v443_v53 }
  0xe4   :  { %v542_v26 = vmul.f32 %v509_v18, %v379_v17 }
  0xe5   :  { %v316_v55 = vpop.f32.mrf.mxu0 }
  0xe6   :  { %v557_v34 = vadd.f32 %v556_v29, %v542_v26 }
  0xe7   :  { %v381_v56 = vpop.f32.mrf.mxu1 }
  0xe8   :  { %v382_v21 = vadd.f32 %v381_v56, %v316_v55 }
  0xe9   :  { %v446_v57 = vpop.f32.mrf.mxu2  ;;  %v511_v58 = vpop.f32.mrf.mxu3 }
  0xea   :  { %v512_v22 = vadd.f32 %v511_v58, %v446_v57 }
  0xec   :  { %v543_v30 = vmul.f32 %v512_v22, %v382_v21 }
  0xed   :  { %v319_v59 = vpop.f32.mrf.mxu0 }
  0xee   :  { %v558_v39 = vadd.f32 %v557_v34, %v543_v30 }
  0xef   :  { %v384_v60 = vpop.f32.mrf.mxu1 }
  0xf0   :  { %v385_v27 = vadd.f32 %v384_v60, %v319_v59 }
  0xf1   :  { %v449_v61 = vpop.f32.mrf.mxu2  ;;  %v514_v62 = vpop.f32.mrf.mxu3 }
  0xf2   :  { %v515_v28 = vadd.f32 %v514_v62, %v449_v61 }
  0xf4   :  { %v544_v35 = vmul.f32 %v515_v28, %v385_v27 }
  0xf5   :  { %v322_v63 = vpop.f32.mrf.mxu0 }
  0xf6   :  { %v559_v43 = vadd.f32 %v558_v39, %v544_v35 }
  0xf7   :  { %v387_v0 = vpop.f32.mrf.mxu1 }
  0xf8   :  { %v388_v31 = vadd.f32 %v387_v0, %v322_v63 }
  0xf9   :  { %v452_v1 = vpop.f32.mrf.mxu2  ;;  %v517_v2 = vpop.f32.mrf.mxu3 }
  0xfa   :  { %v518_v32 = vadd.f32 %v517_v2, %v452_v1 }
  0xfc   :  { %v545_v40 = vmul.f32 %v518_v32, %v388_v31 }
  0xfd   :  { %v325_v3 = vpop.f32.mrf.mxu0 }
  0xfe   :  { %v560_v49 = vadd.f32 %v559_v43, %v545_v40 }
  0xff   :  { %v390_v4 = vpop.f32.mrf.mxu1 }
 0x100   :  { %v391_v36 = vadd.f32 %v390_v4, %v325_v3 }
 0x101   :  { %v455_v5 = vpop.f32.mrf.mxu2  ;;  %v520_v6 = vpop.f32.mrf.mxu3 }
 0x102   :  { %v521_v37 = vadd.f32 %v520_v6, %v455_v5 }
 0x104   :  { %v546_v46 = vmul.f32 %v521_v37, %v391_v36 }
 0x105   :  { %v328_v7 = vpop.f32.mrf.mxu0 }
 0x106   :  { %v561_v54 = vadd.f32 %v560_v49, %v546_v46 }
 0x107   :  { %v393_v8 = vpop.f32.mrf.mxu1 }
 0x108   :  { %v394_v41 = vadd.f32 %v393_v8, %v328_v7 }
 0x109   :  { %v458_v9 = vpop.f32.mrf.mxu2  ;;  %v523_v10 = vpop.f32.mrf.mxu3 }
 0x10a   :  { %v524_v42 = vadd.f32 %v523_v10, %v458_v9 }
 0x10c   :  { %v547_v50 = vmul.f32 %v524_v42, %v394_v41 }
 0x10d   :  { %v331_v15 = vpop.f32.mrf.mxu0 }
 0x10e   :  { %v562_v57 = vadd.f32 %v561_v54, %v547_v50 }
 0x10f   :  { %v396_v19 = vpop.f32.mrf.mxu1 }
 0x110   :  { %v397_v47 = vadd.f32 %v396_v19, %v331_v15 }
 0x111   :  { %v461_v23 = vpop.f32.mrf.mxu2  ;;  %v526_v24 = vpop.f32.mrf.mxu3 }
 0x112   :  { %v527_v48 = vadd.f32 %v526_v24, %v461_v23 }
 0x114   :  { %v548_v55 = vmul.f32 %v527_v48, %v397_v47 }
 0x115   :  { %v334_v33 = vpop.f32.mrf.mxu0 }
 0x116   :  { %v563_v62 = vadd.f32 %v562_v57, %v548_v55 }
 0x117   :  { %v399_v38 = vpop.f32.mrf.mxu1 }
 0x118   :  { %v400_v51 = vadd.f32 %v399_v38, %v334_v33 }
 0x119   :  { %v464_v44 = vpop.f32.mrf.mxu2  ;;  %v529_v45 = vpop.f32.mrf.mxu3 }
 0x11a   :  { %v530_v52 = vadd.f32 %v529_v45, %v464_v44 }
 0x11c   :  { %v549_v58 = vmul.f32 %v530_v52, %v400_v51 }
 0x11d   :  { %v337_v53 = vpop.f32.mrf.mxu0 }
 0x11e   :  { %v564_v0 = vadd.f32 %v563_v62, %v549_v58 }
 0x11f   :  { %v402_v56 = vpop.f32.mrf.mxu1 }
 0x120   :  { %v403_v59 = vadd.f32 %v402_v56, %v337_v53 }
 0x121   :  { %v467_v60 = vpop.f32.mrf.mxu2  ;;  %v532_v61 = vpop.f32.mrf.mxu3 }
 0x122   :  { %v533_v63 = vadd.f32 %v532_v61, %v467_v60 }
 0x124   :  { %v550_v1 = vmul.f32 %v533_v63, %v403_v59 }
 0x126   :  { %v565_v2 = vadd.f32 %v564_v0, %v550_v1 }
 0x128   :  { %v566_v3 = vrot.slane %v565_v2, 4 }
 0x12a   :  { %v567_v4 = vadd.f32 %v566_v3, %v565_v2 }
 0x12c   :  { %v568_v5 = vrot.slane %v567_v4, 2 }
 0x12e   :  { %v569_v6 = vadd.f32 %v568_v5, %v567_v4 }
 0x130   :  { %v570_v7 = vrot.slane %v569_v6, 1 }
 0x132   :  { %v571_v8 = vadd.f32 %v570_v7, %v569_v6 }
 0x134   :  { %572 = vst [vmem:[%s1008_s3] sm:$0x1] %v571_v8 }

</bundles_post_ra>
